<compile_context>
chip_gen: v7x
topology: tpu7x:2x2x1
jax: 0.10.0
libtpu: 0.0.40
codegen_flags: <defaults>
</compile_context>

<pallas_src>
import math

import jax
import jax.numpy as jnp
from jax import lax
from jax.experimental import pallas as pl
from jax.experimental.pallas import tpu as pltpu


# --------------------------------------------------------------------------------------
# Fused kernel: conv1 + GroupNorm + ReLU + conv2
# --------------------------------------------------------------------------------------
def _make_fused_kernel(Bt, H1, W1, H2, W2, E, eps=1e-5):
    inv_n = 1.0 / float(H1 * W1)

    def kernel(z_ref, u_ref, t_ref, gsum_ref, gbcast_ref, aff_ref, b2_ref, o_ref):
        # z_ref:      (Bt, Hq, Wq*Cz)   space-to-depth input rows
        # u_ref:      (2, Wq*Cz, W1*E)  conv1 weights, W-taps folded into K/N (one per ta)
        # t_ref:      (3, W1*E, W2*E)   conv2 weights, kw-taps folded into K/N (one per kh)
        # gsum_ref:   (W1*E, E)         tiled identity: per-channel sum over W1 lane groups
        # gbcast_ref: (E, W1*E)         tiled identity: per-channel broadcast to W1 groups
        # aff_ref:    (2, E)            rows: [gamma, beta]
        # b2_ref:     (1, W2*E)         conv2 bias, tiled per output column
        # o_ref:      (Bt, H2, W2*E)
        gsum = gsum_ref[...]
        gbcast = gbcast_ref[...]
        gamma = aff_ref[0:1, :]
        beta = aff_ref[1:2, :]
        b2row = b2_ref[...]

        for bi in range(Bt):
            # ---- conv1 (k=8, s=4): two matmuls with K = Wq*Cz ----
            y1 = jnp.dot(z_ref[bi, pl.ds(0, H1), :], u_ref[0],
                         preferred_element_type=jnp.float32)
            y1 = y1 + jnp.dot(z_ref[bi, pl.ds(1, H1), :], u_ref[1],
                              preferred_element_type=jnp.float32)
            # y1: (H1, W1*E). conv1 bias omitted: GroupNorm mean subtraction cancels it.

            # ---- GroupNorm(E, E): one-pass per-channel stats via tiny matmuls ----
            col = jnp.sum(y1, axis=0, keepdims=True)            # (1, W1*E)
            colsq = jnp.sum(y1 * y1, axis=0, keepdims=True)     # (1, W1*E)
            red = jnp.dot(jnp.concatenate([col, colsq], axis=0), gsum,
                          preferred_element_type=jnp.float32)   # (2, E)
            mean = red[0:1, :] * inv_n
            var = red[1:2, :] * inv_n - mean * mean
            inv_std = lax.rsqrt(var + eps)
            scale = gamma * inv_std                              # (1, E)
            shift = beta - mean * scale                          # (1, E)
            ss = jnp.dot(jnp.concatenate([scale, shift], axis=0), gbcast,
                         preferred_element_type=jnp.float32)     # (2, W1*E)
            y1 = jnp.maximum(y1 * ss[0:1, :] + ss[1:2, :], 0.0)  # affine + ReLU

            # ---- conv2 (k=3, s=2): 3 matmuls (one per kh), kw folded into T ----
            y2 = None
            for kh in range(3):
                lhs = jnp.concatenate(
                    [y1[kh + 2 * h2:kh + 2 * h2 + 1, :] for h2 in range(H2)],
                    axis=0)                                      # (H2, W1*E)
                p = jnp.dot(lhs, t_ref[kh], preferred_element_type=jnp.float32)
                y2 = p if y2 is None else y2 + p
            y2 = y2 + b2row                                      # (H2, W2*E)

            o_ref[bi] = y2.astype(o_ref.dtype)

    return kernel


# --------------------------------------------------------------------------------------
# Wrapper
# --------------------------------------------------------------------------------------
def patch_embed2(x, params):
    """x: (B, C, H, W) float32 -> (B, num_patch, embed_dim).  use_norm=True path."""
    w1, gamma, beta, w2, b2 = (params[k] for k in ("w1", "gamma", "beta", "w2", "b2"))
    # params["b1"] is intentionally unused: GroupNorm's mean subtraction cancels it exactly.
    B, C, H, W = x.shape
    E = w1.shape[0]
    assert H % 4 == 0 and W % 4 == 0 and H >= 8 and W >= 8

    Hq, Wq = H // 4, W // 4
    Cz = C * 16
    H1 = (H - 8) // 4 + 1
    W1 = (W - 8) // 4 + 1
    H2 = (H1 - 3) // 2 + 1
    W2 = (W1 - 3) // 2 + 1
    f32 = jnp.float32

    # space-to-depth relayout: z[b, hp, wp*Cz + c*16 + i*4 + j] = x[b, c, 4*hp+i, 4*wp+j]
    # TODO(synk): this is a real HBM permutation pass; fuse it into the input producer
    # (or pre-swizzle frames offline) to reclaim this bandwidth at real resolutions.
    z = x.reshape(B, C, Hq, 4, Wq, 4).transpose(0, 2, 4, 1, 3, 5).reshape(B, Hq, Wq * Cz)

    # conv1 weights: w1z[ta, tb, c*16+i*4+j, e] = w1[e, c, 4*ta+i, 4*tb+j]
    w1z = w1.reshape(E, C, 2, 4, 2, 4).transpose(2, 4, 1, 3, 5, 0).reshape(2, 2, Cz, E)
    # fold the tb (W) taps into a block matrix (Wq*Cz, W1*E), one per ta
    wsel = (jnp.arange(Wq)[None, :, None]
            == jnp.arange(W1)[None, None, :] + jnp.arange(2)[:, None, None]).astype(f32)
    U = jnp.einsum('bwl,abce->awcle', wsel, w1z).reshape(2, Wq * Cz, W1 * E)

    # conv2 weights: w2t[kh, kw, c_in, e_out] = w2[e_out, c_in, kh, kw]
    w2t = w2.transpose(2, 3, 1, 0)
    vsel = (jnp.arange(W1)[None, :, None]
            == 2 * jnp.arange(W2)[None, None, :] + jnp.arange(3)[:, None, None]).astype(f32)
    T = jnp.einsum('kab,hkce->hacbe', vsel, w2t).reshape(3, W1 * E, W2 * E)

    eye = jnp.eye(E, dtype=f32)
    gsum = jnp.tile(eye, (W1, 1))                       # (W1*E, E)
    gbcast = jnp.tile(eye, (1, W1))                     # (E, W1*E)
    aff = jnp.stack([gamma, beta], axis=0)              # (2, E)
    b2row = jnp.tile(b2, (W2,)).reshape(1, W2 * E)      # (1, W2*E)

    # batch tiling: >=2 "parallel" steps when possible (v7x 2 TCs); merge batch elements
    # per step when B > 2 to amortize per-step overhead on single-TC parts (v5e/v6e).
    num_steps = 2 if (B >= 2 and B % 2 == 0) else B
    Bt = B // num_steps

    kernel = _make_fused_kernel(Bt, H1, W1, H2, W2, E)
    out = pl.pallas_call(
        kernel,
        out_shape=jax.ShapeDtypeStruct((B, H2, W2 * E), x.dtype),
        grid=(num_steps,),
        in_specs=[
            pl.BlockSpec((Bt, Hq, Wq * Cz), lambda s: (s, 0, 0)),
            pl.BlockSpec((2, Wq * Cz, W1 * E), lambda s: (0, 0, 0)),
            pl.BlockSpec((3, W1 * E, W2 * E), lambda s: (0, 0, 0)),
            pl.BlockSpec((W1 * E, E), lambda s: (0, 0)),
            pl.BlockSpec((E, W1 * E), lambda s: (0, 0)),
            pl.BlockSpec((2, E), lambda s: (0, 0)),
            pl.BlockSpec((1, W2 * E), lambda s: (0, 0)),
        ],
        out_specs=pl.BlockSpec((Bt, H2, W2 * E), lambda s: (s, 0, 0)),
        compiler_params=pltpu.CompilerParams(dimension_semantics=("parallel",)),
    )(z, U, T, gsum, gbcast, aff, b2row)

    return out.reshape(B, H2 * W2, E)  # 'b c h w -> b (h w) c'


# --------------------------------------------------------------------------------------
# Pure-JAX reference (for correctness check)
# --------------------------------------------------------------------------------------
def patch_embed2_ref(x, params):
    w1, b1, gamma, beta, w2, b2 = (params[k] for k in ("w1", "b1", "gamma", "beta", "w2", "b2"))
    dn = ("NCHW", "OIHW", "NCHW")
    y = lax.conv_general_dilated(x, w1, (4, 4), "VALID", dimension_numbers=dn)
    y = y + b1[None, :, None, None]
    mean = y.mean(axis=(2, 3), keepdims=True)
    var = ((y - mean) ** 2).mean(axis=(2, 3), keepdims=True)
    y = (y - mean) / jnp.sqrt(var + 1e-5)
    y = y * gamma[None, :, None, None] + beta[None, :, None, None]
    y = jnp.maximum(y, 0.0)
    y = lax.conv_general_dilated(y, w2, (2, 2), "VALID", dimension_numbers=dn)
    y = y + b2[None, :, None, None]
    B, E, H2, W2 = y.shape
    return y.reshape(B, E, H2 * W2).transpose(0, 2, 1)


# --------------------------------------------------------------------------------------
# Main
# --------------------------------------------------------------------------------------
if __name__ == "__main__":
    # small shapes consistent with the module: batch=2, channels=4, spatial=32, embed_dim=32
    B, C, H, W, E = 2, 4, 32, 32, 32

    key = jax.random.PRNGKey(0)
    k_x, k_w1, k_b1, k_g, k_be, k_w2, k_b2 = jax.random.split(key, 7)

    x = jax.random.normal(k_x, (B, C, H, W), dtype=jnp.float32)

    fan1 = C * 8 * 8
    fan2 = E * 3 * 3
    params = {
        "w1": jax.random.normal(k_w1, (E, C, 8, 8), dtype=jnp.float32) / math.sqrt(fan1),
        "b1": jax.random.normal(k_b1, (E,), dtype=jnp.float32) * 0.1,
        "gamma": 1.0 + 0.1 * jax.random.normal(k_g, (E,), dtype=jnp.float32),
        "beta": 0.1 * jax.random.normal(k_be, (E,), dtype=jnp.float32),
        "w2": jax.random.normal(k_w2, (E, E, 3, 3), dtype=jnp.float32) / math.sqrt(fan2),
        "b2": jax.random.normal(k_b2, (E,), dtype=jnp.float32) * 0.1,
    }

    fwd = jax.jit(patch_embed2)
    out = jax.block_until_ready(fwd(x, params))
    ref = jax.block_until_ready(patch_embed2_ref(x, params))

    H1 = (H - 8) // 4 + 1
    H2 = (H1 - 3) // 2 + 1
    assert out.shape == (B, H2 * H2, E), out.shape
    assert jnp.allclose(out, ref, atol=1e-4, rtol=1e-4), float(jnp.max(jnp.abs(out - ref)))

    print("KERNEL_OK")
</pallas_src>

<mosaic_0001>
module attributes {stable_mosaic.version = 11 : i64} {
  func.func @kernel(%arg0: i32, %arg1: memref<1x8x512xf32, #tpu.memory_space<vmem>>, %arg2: memref<2x512x224xf32, #tpu.memory_space<vmem>>, %arg3: memref<3x224x96xf32, #tpu.memory_space<vmem>>, %arg4: memref<224x32xf32, #tpu.memory_space<vmem>>, %arg5: memref<32x224xf32, #tpu.memory_space<vmem>>, %arg6: memref<2x32xf32, #tpu.memory_space<vmem>>, %arg7: memref<1x96xf32, #tpu.memory_space<vmem>>, %arg8: memref<1x3x96xf32, #tpu.memory_space<vmem>>) attributes {dimension_semantics = [#tpu.dimension_semantics<parallel>], iteration_bounds = array<i64: 2>, scalar_prefetch = 0 : i64, scratch_operands = 0 : i64, tpu.core_type = #tpu.core_type<tc>, window_params = [{transform_indices = @transform_0, window_bounds = array<i64: 1, 8, 512>}, {pipeline_mode = #tpu.pipeline_mode<synchronous>, transform_indices = @transform_1, window_bounds = array<i64: 2, 512, 224>}, {pipeline_mode = #tpu.pipeline_mode<synchronous>, transform_indices = @transform_2, window_bounds = array<i64: 3, 224, 96>}, {pipeline_mode = #tpu.pipeline_mode<synchronous>, transform_indices = @transform_3, window_bounds = array<i64: 224, 32>}, {pipeline_mode = #tpu.pipeline_mode<synchronous>, transform_indices = @transform_4, window_bounds = array<i64: 32, 224>}, {pipeline_mode = #tpu.pipeline_mode<synchronous>, transform_indices = @transform_5, window_bounds = array<i64: 2, 32>}, {pipeline_mode = #tpu.pipeline_mode<synchronous>, transform_indices = @transform_6, window_bounds = array<i64: 1, 96>}, {transform_indices = @transform_7, window_bounds = array<i64: 1, 3, 96>}]} {
    %c0 = arith.constant 0 : index
    %c0_0 = arith.constant 0 : index
    %0 = vector.load %arg4[%c0, %c0_0] : memref<224x32xf32, #tpu.memory_space<vmem>>, vector<224x32xf32>
    %c0_1 = arith.constant 0 : index
    %c0_2 = arith.constant 0 : index
    %1 = vector.load %arg5[%c0_1, %c0_2] : memref<32x224xf32, #tpu.memory_space<vmem>>, vector<32x224xf32>
    %c0_3 = arith.constant 0 : index
    %c0_4 = arith.constant 0 : index
    %2 = vector.load %arg6[%c0_3, %c0_4] : memref<2x32xf32, #tpu.memory_space<vmem>>, vector<1x32xf32>
    %c1 = arith.constant 1 : index
    %c0_5 = arith.constant 0 : index
    %3 = vector.load %arg6[%c1, %c0_5] : memref<2x32xf32, #tpu.memory_space<vmem>>, vector<1x32xf32>
    %c0_6 = arith.constant 0 : index
    %c0_7 = arith.constant 0 : index
    %4 = vector.load %arg7[%c0_6, %c0_7] : memref<1x96xf32, #tpu.memory_space<vmem>>, vector<1x96xf32>
    %c0_8 = arith.constant 0 : index
    %c0_9 = arith.constant 0 : index
    %c0_10 = arith.constant 0 : index
    %5 = vector.load %arg1[%c0_8, %c0_9, %c0_10] : memref<1x8x512xf32, #tpu.memory_space<vmem>>, vector<1x7x512xf32>
    %6 = vector.shape_cast %5 : vector<1x7x512xf32> to vector<7x512xf32>
    %c0_11 = arith.constant 0 : index
    %c0_12 = arith.constant 0 : index
    %c0_13 = arith.constant 0 : index
    %7 = vector.load %arg2[%c0_11, %c0_12, %c0_13] : memref<2x512x224xf32, #tpu.memory_space<vmem>>, vector<1x512x224xf32>
    %8 = vector.shape_cast %7 : vector<1x512x224xf32> to vector<512x224xf32>
    %cst = arith.constant dense<0.000000e+00> : vector<7x224xf32>
    %9 = tpu.matmul %6, %8, %cst {dimension_numbers = #tpu.dot_dimension_numbers<[1], [0], [0], [1], [0, 0, 1, 1], [], []>} : vector<7x512xf32>, vector<512x224xf32>, vector<7x224xf32> -> vector<7x224xf32>
    %c0_14 = arith.constant 0 : index
    %c1_15 = arith.constant 1 : index
    %c0_16 = arith.constant 0 : index
    %10 = vector.load %arg1[%c0_14, %c1_15, %c0_16] : memref<1x8x512xf32, #tpu.memory_space<vmem>>, vector<1x7x512xf32>
    %11 = vector.shape_cast %10 : vector<1x7x512xf32> to vector<7x512xf32>
    %c1_17 = arith.constant 1 : index
    %c0_18 = arith.constant 0 : index
    %c0_19 = arith.constant 0 : index
    %12 = vector.load %arg2[%c1_17, %c0_18, %c0_19] : memref<2x512x224xf32, #tpu.memory_space<vmem>>, vector<1x512x224xf32>
    %13 = vector.shape_cast %12 : vector<1x512x224xf32> to vector<512x224xf32>
    %cst_20 = arith.constant dense<0.000000e+00> : vector<7x224xf32>
    %14 = tpu.matmul %11, %13, %cst_20 {dimension_numbers = #tpu.dot_dimension_numbers<[1], [0], [0], [1], [0, 0, 1, 1], [], []>} : vector<7x512xf32>, vector<512x224xf32>, vector<7x224xf32> -> vector<7x224xf32>
    %15 = arith.addf %9, %14 : vector<7x224xf32>
    %cst_21 = arith.constant dense<0.000000e+00> : vector<224xf32>
    %16 = vector.multi_reduction <add>, %15, %cst_21 [0] : vector<7x224xf32> to vector<224xf32>
    %17 = vector.shape_cast %16 : vector<224xf32> to vector<1x224xf32>
    %18 = arith.mulf %15, %15 : vector<7x224xf32>
    %cst_22 = arith.constant dense<0.000000e+00> : vector<224xf32>
    %19 = vector.multi_reduction <add>, %18, %cst_22 [0] : vector<7x224xf32> to vector<224xf32>
    %20 = vector.shape_cast %19 : vector<224xf32> to vector<1x224xf32>
    %21 = tpu.concatenate %17, %20 in 0 : vector<1x224xf32>, vector<1x224xf32> -> vector<2x224xf32>
    %cst_23 = arith.constant dense<0.000000e+00> : vector<2x32xf32>
    %22 = tpu.matmul %21, %0, %cst_23 {dimension_numbers = #tpu.dot_dimension_numbers<[1], [0], [0], [1], [0, 0, 1, 1], [], []>} : vector<2x224xf32>, vector<224x32xf32>, vector<2x32xf32> -> vector<2x32xf32>
    %23 = vector.extract_strided_slice %22 {offsets = [0, 0], sizes = [1, 32], strides = [1, 1]} : vector<2x32xf32> to vector<1x32xf32>
    %cst_24 = arith.constant 0.0204081628 : f32
    %24 = vector.broadcast %cst_24 : f32 to vector<1x32xf32>
    %25 = arith.mulf %23, %24 : vector<1x32xf32>
    %26 = vector.extract_strided_slice %22 {offsets = [1, 0], sizes = [1, 32], strides = [1, 1]} : vector<2x32xf32> to vector<1x32xf32>
    %cst_25 = arith.constant 0.0204081628 : f32
    %27 = vector.broadcast %cst_25 : f32 to vector<1x32xf32>
    %28 = arith.mulf %26, %27 : vector<1x32xf32>
    %29 = arith.mulf %25, %25 : vector<1x32xf32>
    %30 = arith.subf %28, %29 : vector<1x32xf32>
    %cst_26 = arith.constant 9.99999974E-6 : f32
    %31 = vector.broadcast %cst_26 : f32 to vector<1x32xf32>
    %32 = arith.addf %30, %31 : vector<1x32xf32>
    %33 = math.rsqrt %32 : vector<1x32xf32>
    %34 = arith.mulf %2, %33 : vector<1x32xf32>
    %35 = arith.mulf %25, %34 : vector<1x32xf32>
    %36 = arith.subf %3, %35 : vector<1x32xf32>
    %37 = tpu.concatenate %34, %36 in 0 : vector<1x32xf32>, vector<1x32xf32> -> vector<2x32xf32>
    %cst_27 = arith.constant dense<0.000000e+00> : vector<2x224xf32>
    %38 = tpu.matmul %37, %1, %cst_27 {dimension_numbers = #tpu.dot_dimension_numbers<[1], [0], [0], [1], [0, 0, 1, 1], [], []>} : vector<2x32xf32>, vector<32x224xf32>, vector<2x224xf32> -> vector<2x224xf32>
    %39 = vector.extract_strided_slice %38 {offsets = [0, 0], sizes = [1, 224], strides = [1, 1]} : vector<2x224xf32> to vector<1x224xf32>
    %40 = vector.broadcast %39 : vector<1x224xf32> to vector<7x224xf32>
    %41 = arith.mulf %15, %40 : vector<7x224xf32>
    %42 = vector.extract_strided_slice %38 {offsets = [1, 0], sizes = [1, 224], strides = [1, 1]} : vector<2x224xf32> to vector<1x224xf32>
    %43 = vector.broadcast %42 : vector<1x224xf32> to vector<7x224xf32>
    %44 = arith.addf %41, %43 : vector<7x224xf32>
    %cst_28 = arith.constant 0.000000e+00 : f32
    %45 = vector.broadcast %cst_28 : f32 to vector<7x224xf32>
    %46 = arith.maximumf %44, %45 : vector<7x224xf32>
    %47 = vector.extract_strided_slice %46 {offsets = [0, 0], sizes = [1, 224], strides = [1, 1]} : vector<7x224xf32> to vector<1x224xf32>
    %48 = vector.extract_strided_slice %46 {offsets = [2, 0], sizes = [1, 224], strides = [1, 1]} : vector<7x224xf32> to vector<1x224xf32>
    %49 = vector.extract_strided_slice %46 {offsets = [4, 0], sizes = [1, 224], strides = [1, 1]} : vector<7x224xf32> to vector<1x224xf32>
    %50 = tpu.concatenate %47, %48, %49 in 0 : vector<1x224xf32>, vector<1x224xf32>, vector<1x224xf32> -> vector<3x224xf32>
    %c0_29 = arith.constant 0 : index
    %c0_30 = arith.constant 0 : index
    %c0_31 = arith.constant 0 : index
    %51 = vector.load %arg3[%c0_29, %c0_30, %c0_31] : memref<3x224x96xf32, #tpu.memory_space<vmem>>, vector<1x224x96xf32>
    %52 = vector.shape_cast %51 : vector<1x224x96xf32> to vector<224x96xf32>
    %cst_32 = arith.constant dense<0.000000e+00> : vector<3x96xf32>
    %53 = tpu.matmul %50, %52, %cst_32 {dimension_numbers = #tpu.dot_dimension_numbers<[1], [0], [0], [1], [0, 0, 1, 1], [], []>} : vector<3x224xf32>, vector<224x96xf32>, vector<3x96xf32> -> vector<3x96xf32>
    %54 = vector.extract_strided_slice %46 {offsets = [1, 0], sizes = [1, 224], strides = [1, 1]} : vector<7x224xf32> to vector<1x224xf32>
    %55 = vector.extract_strided_slice %46 {offsets = [3, 0], sizes = [1, 224], strides = [1, 1]} : vector<7x224xf32> to vector<1x224xf32>
    %56 = vector.extract_strided_slice %46 {offsets = [5, 0], sizes = [1, 224], strides = [1, 1]} : vector<7x224xf32> to vector<1x224xf32>
    %57 = tpu.concatenate %54, %55, %56 in 0 : vector<1x224xf32>, vector<1x224xf32>, vector<1x224xf32> -> vector<3x224xf32>
    %c1_33 = arith.constant 1 : index
    %c0_34 = arith.constant 0 : index
    %c0_35 = arith.constant 0 : index
    %58 = vector.load %arg3[%c1_33, %c0_34, %c0_35] : memref<3x224x96xf32, #tpu.memory_space<vmem>>, vector<1x224x96xf32>
    %59 = vector.shape_cast %58 : vector<1x224x96xf32> to vector<224x96xf32>
    %cst_36 = arith.constant dense<0.000000e+00> : vector<3x96xf32>
    %60 = tpu.matmul %57, %59, %cst_36 {dimension_numbers = #tpu.dot_dimension_numbers<[1], [0], [0], [1], [0, 0, 1, 1], [], []>} : vector<3x224xf32>, vector<224x96xf32>, vector<3x96xf32> -> vector<3x96xf32>
    %61 = arith.addf %53, %60 : vector<3x96xf32>
    %62 = vector.extract_strided_slice %46 {offsets = [2, 0], sizes = [1, 224], strides = [1, 1]} : vector<7x224xf32> to vector<1x224xf32>
    %63 = vector.extract_strided_slice %46 {offsets = [4, 0], sizes = [1, 224], strides = [1, 1]} : vector<7x224xf32> to vector<1x224xf32>
    %64 = vector.extract_strided_slice %46 {offsets = [6, 0], sizes = [1, 224], strides = [1, 1]} : vector<7x224xf32> to vector<1x224xf32>
    %65 = tpu.concatenate %62, %63, %64 in 0 : vector<1x224xf32>, vector<1x224xf32>, vector<1x224xf32> -> vector<3x224xf32>
    %c2 = arith.constant 2 : index
    %c0_37 = arith.constant 0 : index
    %c0_38 = arith.constant 0 : index
    %66 = vector.load %arg3[%c2, %c0_37, %c0_38] : memref<3x224x96xf32, #tpu.memory_space<vmem>>, vector<1x224x96xf32>
    %67 = vector.shape_cast %66 : vector<1x224x96xf32> to vector<224x96xf32>
    %cst_39 = arith.constant dense<0.000000e+00> : vector<3x96xf32>
    %68 = tpu.matmul %65, %67, %cst_39 {dimension_numbers = #tpu.dot_dimension_numbers<[1], [0], [0], [1], [0, 0, 1, 1], [], []>} : vector<3x224xf32>, vector<224x96xf32>, vector<3x96xf32> -> vector<3x96xf32>
    %69 = arith.addf %61, %68 : vector<3x96xf32>
    %70 = vector.broadcast %4 : vector<1x96xf32> to vector<3x96xf32>
    %71 = arith.addf %69, %70 : vector<3x96xf32>
    %c0_40 = arith.constant 0 : index
    %c0_41 = arith.constant 0 : index
    %c0_42 = arith.constant 0 : index
    %72 = vector.load %arg8[%c0_40, %c0_41, %c0_42] : memref<1x3x96xf32, #tpu.memory_space<vmem>>, vector<1x3x96xf32>
    %73 = vector.shape_cast %72 : vector<1x3x96xf32> to vector<3x96xf32>
    %74 = vector.shape_cast %71 : vector<3x96xf32> to vector<1x3x96xf32>
    tpu.vector_store %arg8[%c0_40, %c0_41, %c0_42], %74 {strides = array<i32>} : memref<1x3x96xf32, #tpu.memory_space<vmem>>, vector<1x3x96xf32>,
    return
  }
  func.func @transform_0(%arg0: i32) -> (i32, i32, i32) {
    %c0_i32 = arith.constant 0 : i32
    %c0_i32_0 = arith.constant 0 : i32
    %c0_i32_1 = arith.constant 0 : i32
    return %arg0, %c0_i32, %c0_i32_0 : i32, i32, i32
  }
  func.func @transform_1(%arg0: i32) -> (i32, i32, i32) {
    %c0_i32 = arith.constant 0 : i32
    %c0_i32_0 = arith.constant 0 : i32
    %c0_i32_1 = arith.constant 0 : i32
    %c0_i32_2 = arith.constant 0 : i32
    return %c0_i32, %c0_i32_0, %c0_i32_1 : i32, i32, i32
  }
  func.func @transform_2(%arg0: i32) -> (i32, i32, i32) {
    %c0_i32 = arith.constant 0 : i32
    %c0_i32_0 = arith.constant 0 : i32
    %c0_i32_1 = arith.constant 0 : i32
    %c0_i32_2 = arith.constant 0 : i32
    return %c0_i32, %c0_i32_0, %c0_i32_1 : i32, i32, i32
  }
  func.func @transform_3(%arg0: i32) -> (i32, i32) {
    %c0_i32 = arith.constant 0 : i32
    %c0_i32_0 = arith.constant 0 : i32
    %c0_i32_1 = arith.constant 0 : i32
    return %c0_i32, %c0_i32_0 : i32, i32
  }
  func.func @transform_4(%arg0: i32) -> (i32, i32) {
    %c0_i32 = arith.constant 0 : i32
    %c0_i32_0 = arith.constant 0 : i32
    %c0_i32_1 = arith.constant 0 : i32
    return %c0_i32, %c0_i32_0 : i32, i32
  }
  func.func @transform_5(%arg0: i32) -> (i32, i32) {
    %c0_i32 = arith.constant 0 : i32
    %c0_i32_0 = arith.constant 0 : i32
    %c0_i32_1 = arith.constant 0 : i32
    return %c0_i32, %c0_i32_0 : i32, i32
  }
  func.func @transform_6(%arg0: i32) -> (i32, i32) {
    %c0_i32 = arith.constant 0 : i32
    %c0_i32_0 = arith.constant 0 : i32
    %c0_i32_1 = arith.constant 0 : i32
    return %c0_i32, %c0_i32_0 : i32, i32
  }
  func.func @transform_7(%arg0: i32) -> (i32, i32, i32) {
    %c0_i32 = arith.constant 0 : i32
    %c0_i32_0 = arith.constant 0 : i32
    %c0_i32_1 = arith.constant 0 : i32
    return %arg0, %c0_i32, %c0_i32_0 : i32, i32, i32
  }
}

</mosaic_0001>

<bundles_post_ra>
// kernel: tile.24
= control target key start
LH: loop header
LB: loop body
LE: loop exit
PB: predicated region body
PF: predicated region fallthrough
CT: control target
= control target key end

     0   :  { %vm92_vm0 = vcmask 1047556   ;;  %s403_s14 = smov 96   ;;  %s404_s10 = smov 64   ;;  %vm3_vm1 = vcmask 261120   ;;  %vm96_vm2 = vcmask 1048320   ;;  %vm139_vm3 = vcmask 785920   ;;  %s792_s0 = inlined_call_operand.vmem [shape: f32[32,7,32], index: 0, kind: input, shape index: {}]   ;;  %s793_s1 = inlined_call_operand.vmem [shape: f32[32,224], index: 1, kind: output, shape index: {}]  }
   0x1   :  { %v348_v0 = vld [vmem:[%s792_s0 + $0x43] ss:$8 sm:$0xf]   ;;  %v356_v12 = vld [vmem:[%s792_s0 + $0x82] ss:$8 sm:$0xf]  }
   0x2   :  { %v349_v1 = vld [vmem:[%s792_s0 + $0x43] ss:$8 sm:$0xf0]   ;;  %v357_v13 = vld [vmem:[%s792_s0 + $0x82] ss:$8 sm:$0xf0]  }
   0x3   :  { %v114_v2 = vsel %vm92_vm0, %v349_v1, %v348_v0  ;;  %v343_v3 = vld [vmem:[%s792_s0 + $0x3] ss:$8 sm:$0xf]   ;;  %v354_v14 = vld [vmem:[%s792_s0 + $0x2] ss:$8 sm:$0xf]   ;;  %v146_v16 = vsel %vm92_vm0, %v357_v13, %v356_v12 }
   0x4   :  { %v344_v4 = vld [vmem:[%s792_s0 + $0x3] ss:$8 sm:$0xf0]   ;;  %115 = vrot.lane.b32.xlu1 %v114_v2, %s403_s14  ;;  %v355_v15 = vld [vmem:[%s792_s0 + $0x2] ss:$8 sm:$0xf0]  }
   0x5   :  { %v93_v5 = vsel %vm92_vm0, %v344_v4, %v343_v3  ;;  %v351_v6 = vld [vmem:[%s792_s0 + $0xc3] ss:$8 sm:$0xf]   ;;  %v136_v17 = vsel %vm92_vm0, %v355_v15, %v354_v14  ;;  %v362_v18 = vld [vmem:[%s792_s0 + $0x86] ss:$8 sm:$0xf]  }
   0x6   :  { %v352_v7 = vld [vmem:[%s792_s0 + $0xc3] ss:$8 sm:$0xf0]   ;;  %94 = vrot.lane.b32.xlu0 %v93_v5, %s403_s14  ;;  %v363_v19 = vld [vmem:[%s792_s0 + $0x86] ss:$8 sm:$0xf0]  }
   0x7   :  { %v125_v8 = vsel %vm92_vm0, %v352_v7, %v351_v6  ;;  %v345_v9 = vld [vmem:[%s792_s0 + $0x83] ss:$8 sm:$0xf]   ;;  %v359_v20 = vld [vmem:[%s792_s0 + $0x6] ss:$8 sm:$0xf]   ;;  %v168_v22 = vsel %vm92_vm0, %v363_v19, %v362_v18 }
   0x8   :  { %v346_v10 = vld [vmem:[%s792_s0 + $0x83] ss:$8 sm:$0xf0]   ;;  %126 = vrot.lane.b32.xlu1 %v125_v8, %s403_s14  ;;  %v360_v21 = vld [vmem:[%s792_s0 + $0x6] ss:$8 sm:$0xf0]  }
   0x9   :  { %v103_v11 = vsel %vm92_vm0, %v346_v10, %v345_v9  ;;  %v368_v23 = vld [vmem:[%s792_s0 + $0xc2] ss:$8 sm:$0xf]   ;;  %v157_v24 = vsel %vm92_vm0, %v360_v21, %v359_v20  ;;  %v323_v26 = vld [vmem:[%s792_s0 + $0x80] ss:$4 sm:$0xff]   ;;  %s405_s8 = smov 32  }
   0xa   :  { %104 = vrot.lane.b32.xlu0 %v103_v11, %s403_s14  ;;  %v369_v25 = vld [vmem:[%s792_s0 + $0xc2] ss:$8 sm:$0xf0]   ;;  %324 = vst.msk [vmem:[%s793_s1 + $0x20] ss:$8 sm:$0x3] %vm3_vm1, %v323_v26  }
   0xb   :  { %v365_v27 = vld [vmem:[%s792_s0 + $0x42] ss:$8 sm:$0xf]   ;;  %325 = vst.msk [vmem:[%s793_s1 + $0x11] ss:$8 sm:$0xc] %vm3_vm1, %v323_v26   ;;  %v190_v29 = vsel %vm92_vm0, %v369_v25, %v368_v23 }
   0xc   :  { %147 = vrot.lane.b32.xlu1 %v146_v16, %s404_s10  ;;  %v366_v28 = vld [vmem:[%s792_s0 + $0x42] ss:$8 sm:$0xf0]   ;;  %326 = vst.msk [vmem:[%s793_s1 + $0x2] ss:$8 sm:$0x30] %vm3_vm1, %v323_v26  }
   0xd   :  { %327 = vst.msk [vmem:[%s793_s1 - $0xd] ss:$8 sm:$0xc0] %vm3_vm1, %v323_v26   ;;  %v179_v30 = vsel %vm92_vm0, %v366_v28, %v365_v27  ;;  %v374_v31 = vld [vmem:[%s792_s0 + $0xc6] ss:$8 sm:$0xf]  }
   0xe   :  { %137 = vrot.lane.b32.xlu0 %v136_v17, %s404_s10  ;;  %v375_v32 = vld [vmem:[%s792_s0 + $0xc6] ss:$8 sm:$0xf0]   ;;  %v379_v35 = vld [vmem:[%s792_s0 + $0x81] ss:$8 sm:$0xf]  }
   0xf   :  { %v371_v33 = vld [vmem:[%s792_s0 + $0x46] ss:$8 sm:$0xf]   ;;  %v212_v36 = vsel %vm92_vm0, %v375_v32, %v374_v31  ;;  %v380_v37 = vld [vmem:[%s792_s0 + $0x81] ss:$8 sm:$0xf0]  }
  0x10   :  { %169 = vrot.lane.b32.xlu1 %v168_v22, %s404_s10  ;;  %v372_v34 = vld [vmem:[%s792_s0 + $0x46] ss:$8 sm:$0xf0]   ;;  %v377_v38 = vld [vmem:[%s792_s0 + $0x1] ss:$8 sm:$0xf]   ;;  %v233_v48 = vsel %vm92_vm0, %v380_v37, %v379_v35 }
  0x11   :  { %v201_v39 = vsel %vm92_vm0, %v372_v34, %v371_v33  ;;  %v378_v40 = vld [vmem:[%s792_s0 + $0x1] ss:$8 sm:$0xf0]   ;;  %v328_v41 = vld [vmem:[%s792_s0 + $0xa0] ss:$4 sm:$0xff]   ;;  %vm226_vm4 = vcmask 523520  }
  0x12   :  { %158 = vrot.lane.b32.xlu0 %v157_v24, %s404_s10  ;;  %329 = vst.msk [vmem:[%s793_s1 + $0x24] ss:$8 sm:$0x3] %vm3_vm1, %v328_v41   ;;  %330 = vst.msk [vmem:[%s793_s1 + $0x15] ss:$8 sm:$0xc] %vm3_vm1, %v328_v41   ;;  %v223_v49 = vsel %vm92_vm0, %v378_v40, %v377_v38 }
  0x13   :  { %331 = vst.msk [vmem:[%s793_s1 + $0x6] ss:$8 sm:$0x30] %vm3_vm1, %v328_v41   ;;  %332 = vst.msk [vmem:[%s793_s1 - $0x9] ss:$8 sm:$0xc0] %vm3_vm1, %v328_v41  }
  0x14   :  { %191 = vrot.lane.b32.xlu1 %v190_v29, %s404_s10  ;;  %v2_v42 = vld [vmem:[%s792_s0] ss:$4 sm:$0xff]   ;;  %v385_v50 = vld [vmem:[%s792_s0 + $0x85] ss:$8 sm:$0xf]  }
  0x15   :  { %v308_v43 = vld [vmem:[%s792_s0 + $0x20] ss:$4 sm:$0xff]   ;;  %4 = vst.msk [vmem:[%s793_s1] ss:$8 sm:$0x3] %vm3_vm1, %v2_v42  }
  0x16   :  { %180 = vrot.lane.b32.xlu0 %v179_v30, %s404_s10  ;;  %v333_v44 = vld [vmem:[%s792_s0 + $0xc0] ss:$4 sm:$0xff]   ;;  %305 = vst.msk [vmem:[%s793_s1 - $0xf] ss:$8 sm:$0xc] %vm3_vm1, %v2_v42  }
  0x17   :  { %306 = vst.msk [vmem:[%s793_s1 - $0x1e] ss:$8 sm:$0x30] %vm3_vm1, %v2_v42   ;;  %307 = vst.msk [vmem:[%s793_s1 - $0x2d] ss:$8 sm:$0xc0] %vm3_vm1, %v2_v42  }
  0x18   :  { %213 = vrot.lane.b32.xlu1 %v212_v36, %s404_s10  ;;  %309 = vst.msk [vmem:[%s793_s1 + $0x4] ss:$8 sm:$0x3] %vm3_vm1, %v308_v43   ;;  %310 = vst.msk [vmem:[%s793_s1 - $0xb] ss:$8 sm:$0xc] %vm3_vm1, %v308_v43  }
  0x19   :  { %311 = vst.msk [vmem:[%s793_s1 - $0x1a] ss:$8 sm:$0x30] %vm3_vm1, %v308_v43   ;;  %312 = vst.msk [vmem:[%s793_s1 - $0x29] ss:$8 sm:$0xc0] %vm3_vm1, %v308_v43  }
  0x1a   :  { %334 = vst.msk [vmem:[%s793_s1 + $0x30] ss:$8 sm:$0x3] %vm3_vm1, %v333_v44   ;;  %335 = vst.msk [vmem:[%s793_s1 + $0x21] ss:$8 sm:$0xc] %vm3_vm1, %v333_v44   ;;  %202 = vrot.lane.b32.xlu0 %v201_v39, %s404_s10 }
  0x1b   :  { %336 = vst.msk [vmem:[%s793_s1 + $0x12] ss:$8 sm:$0x30] %vm3_vm1, %v333_v44   ;;  %337 = vst.msk [vmem:[%s793_s1 + $0x3] ss:$8 sm:$0xc0] %vm3_vm1, %v333_v44  }
  0x1c   :  { %v338_v45 = vld [vmem:[%s792_s0 + $0xe0] ss:$4 sm:$0xff]   ;;  %v386_v51 = vld [vmem:[%s792_s0 + $0x85] ss:$8 sm:$0xf0]   ;;  %234 = vrot.lane.b32.xlu1 %v233_v48, %s405_s8 }
  0x1d   :  { %v313_v46 = vld [vmem:[%s792_s0 + $0x40] ss:$4 sm:$0xff]   ;;  %339 = vst.msk [vmem:[%s793_s1 + $0x34] ss:$8 sm:$0x3] %vm3_vm1, %v338_v45   ;;  %v255_v54 = vsel %vm92_vm0, %v386_v51, %v385_v50 }
  0x1e   :  { %v318_v47 = vld [vmem:[%s792_s0 + $0x60] ss:$4 sm:$0xff]   ;;  %340 = vst.msk [vmem:[%s793_s1 + $0x25] ss:$8 sm:$0xc] %vm3_vm1, %v338_v45   ;;  %224 = vrot.lane.b32.xlu0 %v223_v49, %s405_s8 }
  0x1f   :  { %341 = vst.msk [vmem:[%s793_s1 + $0x16] ss:$8 sm:$0x30] %vm3_vm1, %v338_v45   ;;  %342 = vst.msk [vmem:[%s793_s1 + $0x7] ss:$8 sm:$0xc0] %vm3_vm1, %v338_v45  }
  0x20   :  { %314 = vst.msk [vmem:[%s793_s1 + $0x10] ss:$8 sm:$0x3] %vm3_vm1, %v313_v46   ;;  %315 = vst.msk [vmem:[%s793_s1 + $0x1] ss:$8 sm:$0xc] %vm3_vm1, %v313_v46   ;;  %256 = vrot.lane.b32.xlu1 %v255_v54, %s405_s8 }
  0x21   :  { %316 = vst.msk [vmem:[%s793_s1 - $0xe] ss:$8 sm:$0x30] %vm3_vm1, %v313_v46   ;;  %317 = vst.msk [vmem:[%s793_s1 - $0x1d] ss:$8 sm:$0xc0] %vm3_vm1, %v313_v46  }
  0x22   :  { %319 = vst.msk [vmem:[%s793_s1 + $0x14] ss:$8 sm:$0x3] %vm3_vm1, %v318_v47   ;;  %320 = vst.msk [vmem:[%s793_s1 + $0x5] ss:$8 sm:$0xc] %vm3_vm1, %v318_v47  }
  0x23   :  { %321 = vst.msk [vmem:[%s793_s1 - $0xa] ss:$8 sm:$0x30] %vm3_vm1, %v318_v47   ;;  %322 = vst.msk [vmem:[%s793_s1 - $0x19] ss:$8 sm:$0xc0] %vm3_vm1, %v318_v47  }
  0x24   :  { %v382_v52 = vld [vmem:[%s792_s0 + $0x5] ss:$8 sm:$0xf]   ;;  %v391_v56 = vld [vmem:[%s792_s0 + $0xc1] ss:$8 sm:$0xf]  }
  0x25   :  { %v383_v53 = vld [vmem:[%s792_s0 + $0x5] ss:$8 sm:$0xf0]   ;;  %v392_v57 = vld [vmem:[%s792_s0 + $0xc1] ss:$8 sm:$0xf0]  }
  0x26   :  { %v244_v55 = vsel %vm92_vm0, %v383_v53, %v382_v52  ;;  %v388_v58 = vld [vmem:[%s792_s0 + $0x41] ss:$8 sm:$0xf]   ;;  %v277_v60 = vsel %vm92_vm0, %v392_v57, %v391_v56  ;;  %v397_v62 = vld [vmem:[%s792_s0 + $0xc5] ss:$8 sm:$0xf]  }
  0x27   :  { %v389_v59 = vld [vmem:[%s792_s0 + $0x41] ss:$8 sm:$0xf0]   ;;  %245 = vrot.lane.b32.xlu0 %v244_v55, %s405_s8  ;;  %v398_v63 = vld [vmem:[%s792_s0 + $0xc5] ss:$8 sm:$0xf0]   ;;  %278 = vrot.lane.b32.xlu1 %v277_v60, %s405_s8 }
  0x28   :  { %v266_v61 = vsel %vm92_vm0, %v389_v59, %v388_v58  ;;  %v394_v0 = vld [vmem:[%s792_s0 + $0x45] ss:$8 sm:$0xf]   ;;  %v299_v2 = vsel %vm92_vm0, %v398_v63, %v397_v62 }
  0x29   :  { %v395_v1 = vld [vmem:[%s792_s0 + $0x45] ss:$8 sm:$0xf0]  }
  0x2a   :  { %v288_v3 = vsel %vm92_vm0, %v395_v1, %v394_v0 }
  0x2b   :  { %267 = vrot.lane.b32.xlu0 %v266_v61, %s405_s8  ;;  %300 = vrot.lane.b32.xlu1 %v299_v2, %s405_s8 }
  0x2f   :  { %289 = vrot.lane.b32.xlu0 %v288_v3, %s405_s8 }
  0x76   :  { %v116_v4 = vpop.permute.xlu1 %115  }
  0x77   :  { %350 = vst.msk [vmem:[%s793_s1 + $0x10] sm:$0xff] %vm96_vm2, %v116_v4  }
  0x78   :  { %v95_v5 = vpop.permute.xlu0 %94  }
  0x79   :  { %97 = vst.msk [vmem:[%s793_s1] sm:$0xff] %vm96_vm2, %v95_v5  }
  0x7a   :  { %v127_v6 = vpop.permute.xlu1 %126  }
  0x7b   :  { %353 = vst.msk [vmem:[%s793_s1 + $0x30] sm:$0xff] %vm96_vm2, %v127_v6  }
  0x7c   :  { %v105_v7 = vpop.permute.xlu0 %104  }
  0x7d   :  { %347 = vst.msk [vmem:[%s793_s1 + $0x20] sm:$0xff] %vm96_vm2, %v105_v7  }
  0x7e   :  { %v148_v8 = vpop.permute.xlu1 %147  }
  0x7f   :  { %358 = vst.msk [vmem:[%s793_s1 + $0x20] sm:$0xff] %vm139_vm3, %v148_v8  }
  0x80   :  { %v138_v9 = vpop.permute.xlu0 %137  }
  0x81   :  { %140 = vst.msk [vmem:[%s793_s1] sm:$0xff] %vm139_vm3, %v138_v9  }
  0x82   :  { %v170_v10 = vpop.permute.xlu1 %169  }
  0x83   :  { %364 = vst.msk [vmem:[%s793_s1 + $0x28] sm:$0xff] %vm139_vm3, %v170_v10  }
  0x84   :  { %v159_v11 = vpop.permute.xlu0 %158  }
  0x85   :  { %361 = vst.msk [vmem:[%s793_s1 + $0x8] sm:$0xff] %vm139_vm3, %v159_v11  }
  0x86   :  { %v192_v12 = vpop.permute.xlu1 %191  }
  0x87   :  { %370 = vst.msk [vmem:[%s793_s1 + $0x30] sm:$0xff] %vm139_vm3, %v192_v12  }
  0x88   :  { %v181_v13 = vpop.permute.xlu0 %180  }
  0x89   :  { %367 = vst.msk [vmem:[%s793_s1 + $0x10] sm:$0xff] %vm139_vm3, %v181_v13  }
  0x8a   :  { %v214_v14 = vpop.permute.xlu1 %213  }
  0x8b   :  { %376 = vst.msk [vmem:[%s793_s1 + $0x38] sm:$0xff] %vm139_vm3, %v214_v14  }
  0x8c   :  { %v203_v15 = vpop.permute.xlu0 %202  }
  0x8d   :  { %373 = vst.msk [vmem:[%s793_s1 + $0x18] sm:$0xff] %vm139_vm3, %v203_v15  }
  0x8e   :  { %v235_v16 = vpop.permute.xlu1 %234  }
  0x8f   :  { %381 = vst.msk [vmem:[%s793_s1 + $0x20] sm:$0xff] %vm226_vm4, %v235_v16  }
  0x90   :  { %v225_v17 = vpop.permute.xlu0 %224  }
  0x91   :  { %227 = vst.msk [vmem:[%s793_s1] sm:$0xff] %vm226_vm4, %v225_v17  }
  0x92   :  { %v257_v18 = vpop.permute.xlu1 %256  }
  0x93   :  { %387 = vst.msk [vmem:[%s793_s1 + $0x28] sm:$0xff] %vm226_vm4, %v257_v18  }
  0x99   :  { %v246_v19 = vpop.permute.xlu0 %245   ;;  %v279_v20 = vpop.permute.xlu1 %278  }
  0x9a   :  { %384 = vst.msk [vmem:[%s793_s1 + $0x8] sm:$0xff] %vm226_vm4, %v246_v19   ;;  %393 = vst.msk [vmem:[%s793_s1 + $0x30] sm:$0xff] %vm226_vm4, %v279_v20  }
  0x9d   :  { %v268_v21 = vpop.permute.xlu0 %267   ;;  %v301_v22 = vpop.permute.xlu1 %300  }
  0x9e   :  { %390 = vst.msk [vmem:[%s793_s1 + $0x10] sm:$0xff] %vm226_vm4, %v268_v21   ;;  %399 = vst.msk [vmem:[%s793_s1 + $0x38] sm:$0xff] %vm226_vm4, %v301_v22  }
  0xa1   :  { %v290_v23 = vpop.permute.xlu0 %289  }
  0xa2   :  { %396 = vst.msk [vmem:[%s793_s1 + $0x18] sm:$0xff] %vm226_vm4, %v290_v23  }

// kernel: tile.28
= control target key start
LH: loop header
LB: loop body
LE: loop exit
PB: predicated region body
PF: predicated region fallthrough
CT: control target
= control target key end

     0   :  { %s22_s0 = inlined_call_operand.vmem [shape: f32[32], index: 0, kind: input, shape index: {}]   ;;  %s23_s1 = inlined_call_operand.vmem [shape: f32[3,32], index: 1, kind: output, shape index: {}]  }
   0x1   :  { %v4_v0 = vld [vmem:[%s22_s0] ss:$0 sm:$0xff] }
   0x2   :  { %5 = vst [vmem:[%s23_s1] sm:$0xf] %v4_v0 }

// kernel: tile.29
= control target key start
LH: loop header
LB: loop body
LE: loop exit
PB: predicated region body
PF: predicated region fallthrough
CT: control target
= control target key end

     0   :  { %vm7_vm0 = vcmask 261120   ;;  %s30_s8 = smov 32   ;;  %vm13_vm1 = vcmask 785920   ;;  %vm19_vm2 = vcmask 523520   ;;  %s47_s0 = inlined_call_operand.vmem [shape: f32[3,32], index: 0, kind: input, shape index: {}]   ;;  %s48_s1 = inlined_call_operand.vmem [shape: f32[1,96], index: 1, kind: output, shape index: {}]  }
   0x1   :  { %v4_v0 = vld [vmem:[%s47_s0] sm:$0xf]  ;;  %s29_s0 = smov 64  }
   0x2   :  { %5 = vst [vmem:[#allocation1] sm:$0xf] %v4_v0 }
   0x9   :  { %v10_v1 = vld [vmem:[#allocation1 + $0x2] sm:$0x1]   ;;  %v6_v2 = vld [vmem:[#allocation1] sm:$0x1]   ;;  %v16_v3 = vld [vmem:[#allocation1 + $0x1] sm:$0x1]  }
   0xa   :  { %11 = vrot.lane.b32.xlu0 %v10_v1, %s29_s0  ;;  %8 = vst.msk [vmem:[#allocation0] sm:$0x1] %vm7_vm0, %v6_v2  }
   0xe   :  { %17 = vrot.lane.b32.xlu0 %v16_v3, %s30_s8 }
  0x7c   :  { %v12_v4 = vpop.permute.xlu0 %11  }
  0x7d   :  { %14 = vst.msk [vmem:[#allocation0] sm:$0x1] %vm13_vm1, %v12_v4  }
  0x80   :  { %v18_v5 = vpop.permute.xlu0 %17  }
  0x81   :  { %20 = vst.msk [vmem:[#allocation0] sm:$0x1] %vm19_vm2, %v18_v5  }
  0x88   :  { %v24_v6 = vld [vmem:[#allocation0] sm:$0x1] }
  0x89   :  { %26 = vst [vmem:[%s48_s1] sm:$0x1] %v24_v6 }

// kernel: patch_embed2.1
= control target key start
LH: loop header
LB: loop body
LE: loop exit
PB: predicated region body
PF: predicated region fallthrough
CT: control target
= control target key end

     0   :  { %s2201_s24 = smov 0   ;;  %s3495_s0 = inlined_call_operand.vmem [shape: f32[2,8,512], index: 0, kind: input, shape index: {}]   ;;  %s3496_s1 = inlined_call_operand.vmem [shape: f32[2,512,224], index: 1, kind: input, shape index: {}]   ;;  %s3497_s2 = inlined_call_operand.vmem [shape: f32[3,224,96], index: 2, kind: input, shape index: {}]   ;;  %s3498_s3 = inlined_call_operand.vmem [shape: f32[224,32], index: 3, kind: input, shape index: {}]   ;;  %s3499_s4 = inlined_call_operand.vmem [shape: f32[32,224], index: 4, kind: input, shape index: {}]   ;;  %s3500_s5 = inlined_call_operand.vmem [shape: f32[2,32], index: 5, kind: input, shape index: {}]   ;;  %s3501_s6 = inlined_call_operand.vmem [shape: f32[1,96], index: 6, kind: input, shape index: {}]   ;;  %s3502_s7 = inlined_call_operand.vmem [shape: f32[2,3,96], index: 7, kind: output, shape index: {}]  }
   0x1 LB: > { %s1500_s25 = sadd.s32 4294967295, %s2157_s24   ;;  %p1504_p0 = scmp.ge.s32.totalorder %s2157_s24, 1  ;;  %s2157_s24 = sphi %s2201_s24, %s17_s24  }
   0x2   : > { %p237_p1 = scmp.lt.s32.totalorder %s2157_s24, 3 }
   0x4   : > { %p238_p2 = pnand %p1504_p0, %p237_p1 }
   0x5   : > { %v1509_v0 = vld [vmem:[%s3496_s1 + $0x408] sm:$0xff] (!%p238_p2)  ;;  %v1511_v1 = vld [vmem:[%s3496_s1 + $0x418] sm:$0xff] (!%p238_p2)  ;;  %v1508_v2 = vld [vmem:[%s3496_s1 + $0x400] sm:$0xff] (!%p238_p2)  ;;  %p268_p3 = scmp.lt.s32.totalorder (!%p238_p2), %s1500_s25, 1  ;;  %vm877_vm0 = vcmask (!%p238_p2), 1046528   ;;  %vm885_vm1 = vcmask (!%p238_p2), 784384  }
   0x6   : > { %241 = sbr.rel (%p238_p2) target bundleno = 1293 (0x50d), region = 48  ;;  %v1701_v3 = vpack.c.bf16 (!%p238_p2), %v1511_v1, %v1509_v0  ;;  %v1510_v4 = vld [vmem:[%s3496_s1 + $0x410] sm:$0xff] (!%p238_p2)  ;;  %v1513_v5 = vld [vmem:[%s3496_s1 + $0x428] sm:$0xff] (!%p238_p2)  ;;  %v1515_v6 = vld [vmem:[%s3496_s1 + $0x438] sm:$0xff] (!%p238_p2)  ;;  %vm909_vm2 = vcmask (!%p238_p2), 1040384   ;;  %vm912_vm3 = vcmask (!%p238_p2), 785408  }
   0x7   : > { %v1703_v7 = vpack.c.bf16 (!%p238_p2), %v1510_v4, %v1508_v2  ;;  %v1705_v8 = vpack.c.bf16 (!%p238_p2), %v1515_v6, %v1513_v5  ;;  %v1512_v9 = vld [vmem:[%s3496_s1 + $0x420] sm:$0xff] (!%p238_p2)  ;;  %v1514_v10 = vld [vmem:[%s3496_s1 + $0x430] sm:$0xff] (!%p238_p2)  ;;  %v1517_v11 = vld [vmem:[%s3496_s1 + $0x448] sm:$0xff] (!%p238_p2)  ;;  %vm1004_vm4 = vcmask (!%p238_p2), 261120   ;;  %vm1113_vm5 = vcmask (!%p238_p2), 1041408  }
   0x8   : > { %1702 = vmatprep.subr.bf16.mxu0 (!%p238_p2), %v1701_v3  ;;  %v1519_v12 = vld [vmem:[%s3496_s1 + $0x458] sm:$0xff] (!%p238_p2)  ;;  %v1707_v13 = vpack.c.bf16 (!%p238_p2), %v1514_v10, %v1512_v9  ;;  %v1516_v15 = vld [vmem:[%s3496_s1 + $0x440] sm:$0xff] (!%p238_p2)  ;;  %v1518_v16 = vld [vmem:[%s3496_s1 + $0x450] sm:$0xff] (!%p238_p2)  ;;  %vm1445_vm6 = vcmask (!%p238_p2), 780288  }
   0x9   : > { %1704 = vmatpush1.bf16.msra.mxu0 (!%p238_p2), %v1703_v7  ;;  %v1709_v14 = vpack.c.bf16 (!%p238_p2), %v1519_v12, %v1517_v11  ;;  %v1521_v17 = vld [vmem:[%s3496_s1 + $0x468] sm:$0xff] (!%p238_p2)  ;;  %v1523_v18 = vld [vmem:[%s3496_s1 + $0x478] sm:$0xff] (!%p238_p2)  ;;  %v1711_v19 = vpack.c.bf16 (!%p238_p2), %v1518_v16, %v1516_v15  ;;  %v1520_v21 = vld [vmem:[%s3496_s1 + $0x460] sm:$0xff] (!%p238_p2) }
   0xa   : > { %1706 = vmatprep.subr.bf16.mxu0 (!%p238_p2), %v1705_v8  ;;  %v1713_v20 = vpack.c.bf16 (!%p238_p2), %v1523_v18, %v1521_v17  ;;  %v1522_v22 = vld [vmem:[%s3496_s1 + $0x470] sm:$0xff] (!%p238_p2)  ;;  %v1525_v23 = vld [vmem:[%s3496_s1 + $0x488] sm:$0xff] (!%p238_p2)  ;;  %v1527_v24 = vld [vmem:[%s3496_s1 + $0x498] sm:$0xff] (!%p238_p2) }
   0xb   : > { %v1715_v25 = vpack.c.bf16 (!%p238_p2), %v1522_v22, %v1520_v21  ;;  %v1717_v26 = vpack.c.bf16 (!%p238_p2), %v1527_v24, %v1525_v23  ;;  %v1524_v27 = vld [vmem:[%s3496_s1 + $0x480] sm:$0xff] (!%p238_p2)  ;;  %v1526_v28 = vld [vmem:[%s3496_s1 + $0x490] sm:$0xff] (!%p238_p2)  ;;  %v1529_v29 = vld [vmem:[%s3496_s1 + $0x4a8] sm:$0xff] (!%p238_p2) }
   0xc   : > { %v1531_v30 = vld [vmem:[%s3496_s1 + $0x4b8] sm:$0xff] (!%p238_p2)  ;;  %v1719_v31 = vpack.c.bf16 (!%p238_p2), %v1526_v28, %v1524_v27  ;;  %v1528_v33 = vld [vmem:[%s3496_s1 + $0x4a0] sm:$0xff] (!%p238_p2)  ;;  %v1530_v34 = vld [vmem:[%s3496_s1 + $0x4b0] sm:$0xff] (!%p238_p2) }
   0xd   : > { %1708 = vmatpush1.bf16.msra.mxu0 %v1707_v13  ;;  %s3504_s25 = smov (!%p268_p3, %s1500_s25), 1  ;;  %v1721_v32 = vpack.c.bf16 %v1531_v30, %v1529_v29  ;;  %v1533_v35 = vld [vmem:[%s3496_s1 + $0x4c8] sm:$0xff]  ;;  %v1535_v36 = vld [vmem:[%s3496_s1 + $0x4d8] sm:$0xff]  ;;  %v1723_v37 = vpack.c.bf16 %v1530_v34, %v1528_v33  ;;  %v1532_v39 = vld [vmem:[%s3496_s1 + $0x4c0] sm:$0xff] }
   0xe   : > { %1710 = vmatprep.subr.bf16.mxu0 %v1709_v14  ;;  %s1700_s28 = sshll.u32 %s3504_s25, 5  ;;  %v1725_v38 = vpack.c.bf16 %v1535_v36, %v1533_v35  ;;  %v1534_v40 = vld [vmem:[%s3496_s1 + $0x4d0] sm:$0xff]  ;;  %v1537_v42 = vld [vmem:[%s3496_s1 + $0x4e8] sm:$0xff]  ;;  %v1539_v43 = vld [vmem:[%s3496_s1 + $0x4f8] sm:$0xff]  ;;  %s1507_s10 = sshll.u32 %s3504_s25, 2 }
   0xf   : > { %s2297_s16 = scalar_lea.vmem %s3495_s0, %s1700_s28  ;;  %v1727_v45 = vpack.c.bf16 %v1534_v40, %v1532_v39  ;;  %v1729_v46 = vpack.c.bf16 %v1539_v43, %v1537_v42  ;;  %v1536_v47 = vld [vmem:[%s3496_s1 + $0x4e0] sm:$0xff]  ;;  %v1538_v48 = vld [vmem:[%s3496_s1 + $0x4f0] sm:$0xff]  ;;  %v1541_v49 = vld [vmem:[%s3496_s1 + $0x508] sm:$0xff]  ;;  %s276_s15 = scalar_lea.vmem %s3502_s7, %s1507_s10 }
  0x10   : > { %v449_v41 = vld [vmem:[%s2297_s16 + $0x8] sm:$0xfe]  ;;  %v1543_v50 = vld [vmem:[%s3496_s1 + $0x518] sm:$0xff]  ;;  %v1731_v51 = vpack.c.bf16 %v1538_v48, %v1536_v47  ;;  %v1540_v53 = vld [vmem:[%s3496_s1 + $0x500] sm:$0xff] }
  0x11   : > { %1712 = vmatpush1.bf16.msra.mxu0 %v1711_v19  ;;  %v586_v44 = vrot.slane %v449_v41, 1  ;;  %v1733_v52 = vpack.c.bf16 %v1543_v50, %v1541_v49  ;;  %v1542_v54 = vld [vmem:[%s3496_s1 + $0x510] sm:$0xff]  ;;  %v1545_v55 = vld [vmem:[%s3496_s1 + $0x528] sm:$0xff]  ;;  %v1547_v56 = vld [vmem:[%s3496_s1 + $0x538] sm:$0xff] }
  0x12   : > { %1714 = vmatprep.subr.bf16.mxu0 %v1713_v20  ;;  %v1735_v57 = vpack.c.bf16 %v1542_v54, %v1540_v53  ;;  %v1737_v58 = vpack.c.bf16 %v1547_v56, %v1545_v55  ;;  %v1544_v59 = vld [vmem:[%s3496_s1 + $0x520] sm:$0xff]  ;;  %v1546_v60 = vld [vmem:[%s3496_s1 + $0x530] sm:$0xff]  ;;  %v1549_v61 = vld [vmem:[%s3496_s1 + $0x548] sm:$0xff] }
  0x13   : > { %657 = vmatprep.mubr.f32.mxu0 %v586_v44  ;;  %v1551_v62 = vld [vmem:[%s3496_s1 + $0x558] sm:$0xff]  ;;  %v1739_v63 = vpack.c.bf16 %v1546_v60, %v1544_v59  ;;  %v1548_v1 = vld [vmem:[%s3496_s1 + $0x540] sm:$0xff]  ;;  %v1550_v2 = vld [vmem:[%s3496_s1 + $0x550] sm:$0xff] }
  0x14   : > { %v1741_v0 = vpack.c.bf16 %v1551_v62, %v1549_v61  ;;  %v1553_v3 = vld [vmem:[%s3496_s1 + $0x568] sm:$0xff]  ;;  %v1555_v4 = vld [vmem:[%s3496_s1 + $0x578] sm:$0xff]  ;;  %v1743_v5 = vpack.c.bf16 %v1550_v2, %v1548_v1  ;;  %v1552_v7 = vld [vmem:[%s3496_s1 + $0x560] sm:$0xff] }
  0x15   : > { %1716 = vmatpush1.bf16.msra.mxu0 %v1715_v25  ;;  %v1745_v6 = vpack.c.bf16 %v1555_v4, %v1553_v3  ;;  %v1554_v8 = vld [vmem:[%s3496_s1 + $0x570] sm:$0xff]  ;;  %v1557_v9 = vld [vmem:[%s3496_s1 + $0x588] sm:$0xff]  ;;  %v1559_v10 = vld [vmem:[%s3496_s1 + $0x598] sm:$0xff] }
  0x16   : > { %1718 = vmatprep.subr.bf16.mxu0 %v1717_v26  ;;  %v1747_v11 = vpack.c.bf16 %v1554_v8, %v1552_v7  ;;  %v1749_v12 = vpack.c.bf16 %v1559_v10, %v1557_v9  ;;  %v1556_v13 = vld [vmem:[%s3496_s1 + $0x580] sm:$0xff]  ;;  %v1558_v14 = vld [vmem:[%s3496_s1 + $0x590] sm:$0xff]  ;;  %v1561_v15 = vld [vmem:[%s3496_s1 + $0x5a8] sm:$0xff] }
  0x17   : > { %v1563_v16 = vld [vmem:[%s3496_s1 + $0x5b8] sm:$0xff]  ;;  %v1751_v17 = vpack.c.bf16 %v1558_v14, %v1556_v13  ;;  %v1560_v19 = vld [vmem:[%s3496_s1 + $0x5a0] sm:$0xff]  ;;  %v1562_v20 = vld [vmem:[%s3496_s1 + $0x5b0] sm:$0xff] }
  0x18   : > { %v1753_v18 = vpack.c.bf16 %v1563_v16, %v1561_v15  ;;  %v1565_v21 = vld [vmem:[%s3496_s1 + $0x5c8] sm:$0xff]  ;;  %v1567_v22 = vld [vmem:[%s3496_s1 + $0x5d8] sm:$0xff]  ;;  %v1755_v23 = vpack.c.bf16 %v1562_v20, %v1560_v19  ;;  %v1564_v25 = vld [vmem:[%s3496_s1 + $0x5c0] sm:$0xff] }
  0x19   : > { %1720 = vmatpush1.bf16.msra.mxu0 %v1719_v31  ;;  %v1757_v24 = vpack.c.bf16 %v1567_v22, %v1565_v21  ;;  %v1566_v26 = vld [vmem:[%s3496_s1 + $0x5d0] sm:$0xff]  ;;  %v1569_v27 = vld [vmem:[%s3496_s1 + $0x5e8] sm:$0xff]  ;;  %v1571_v28 = vld [vmem:[%s3496_s1 + $0x5f8] sm:$0xff] }
  0x1a   : > { %1722 = vmatprep.subr.bf16.mxu0 %v1721_v32  ;;  %v1759_v29 = vpack.c.bf16 %v1566_v26, %v1564_v25  ;;  %v1761_v30 = vpack.c.bf16 %v1571_v28, %v1569_v27  ;;  %v1568_v31 = vld [vmem:[%s3496_s1 + $0x5e0] sm:$0xff]  ;;  %v1570_v32 = vld [vmem:[%s3496_s1 + $0x5f0] sm:$0xff]  ;;  %v1573_v33 = vld [vmem:[%s3496_s1 + $0x608] sm:$0xff] }
  0x1b   : > { %v1575_v34 = vld [vmem:[%s3496_s1 + $0x618] sm:$0xff]  ;;  %v1763_v35 = vpack.c.bf16 %v1570_v32, %v1568_v31  ;;  %v448_v36 = vld [vmem:[%s2297_s16] sm:$0xfe]  ;;  %v1574_v39 = vld [vmem:[%s3496_s1 + $0x610] sm:$0xff] }
  0x1c   : > { %v451_v40 = vld [vmem:[%s2297_s16 + $0x18] sm:$0xfe]  ;;  %v1577_v41 = vld [vmem:[%s3496_s1 + $0x628] sm:$0xff]  ;;  %v585_v43 = vrot.slane %v448_v36, 1  ;;  %v1576_v47 = vld [vmem:[%s3496_s1 + $0x620] sm:$0xff] }
  0x1d   : > { %1724 = vmatpush1.bf16.msra.mxu0 %v1723_v37  ;;  %v1765_v37 = vpack.c.bf16 %v1575_v34, %v1573_v33  ;;  %v1579_v42 = vld [vmem:[%s3496_s1 + $0x638] sm:$0xff]  ;;  %v1578_v48 = vld [vmem:[%s3496_s1 + $0x630] sm:$0xff]  ;;  %v1581_v49 = vld [vmem:[%s3496_s1 + $0x648] sm:$0xff] }
  0x1e   : > { %1726 = vmatprep.subr.bf16.mxu0 %v1725_v38  ;;  %v1572_v38 = vld [vmem:[%s3496_s1 + $0x600] sm:$0xff]  ;;  %v1583_v50 = vld [vmem:[%s3496_s1 + $0x658] sm:$0xff]  ;;  %v1582_v54 = vld [vmem:[%s3496_s1 + $0x650] sm:$0xff] }
  0x1f   : > { %v1767_v44 = vpack.c.bf16 %v1574_v39, %v1572_v38  ;;  %v1580_v53 = vld [vmem:[%s3496_s1 + $0x640] sm:$0xff]  ;;  %v1585_v55 = vld [vmem:[%s3496_s1 + $0x668] sm:$0xff]  ;;  %v1587_v56 = vld [vmem:[%s3496_s1 + $0x678] sm:$0xff] }
  0x20   : > { %v1584_v59 = vld [vmem:[%s3496_s1 + $0x660] sm:$0xff]  ;;  %v1586_v60 = vld [vmem:[%s3496_s1 + $0x670] sm:$0xff]  ;;  %v1589_v61 = vld [vmem:[%s3496_s1 + $0x688] sm:$0xff] }
  0x21   : > { %1728 = vmatpush1.bf16.msra.mxu0 %v1727_v45  ;;  %v588_v45 = vrot.slane %v451_v40, 1  ;;  %v1591_v62 = vld [vmem:[%s3496_s1 + $0x698] sm:$0xff]  ;;  %v1588_v1 = vld [vmem:[%s3496_s1 + $0x680] sm:$0xff]  ;;  %v1590_v2 = vld [vmem:[%s3496_s1 + $0x690] sm:$0xff] }
  0x22   : > { %1730 = vmatprep.subr.bf16.mxu0 %v1729_v46  ;;  %v1769_v46 = vpack.c.bf16 %v1579_v42, %v1577_v41  ;;  %v1593_v3 = vld [vmem:[%s3496_s1 + $0x6a8] sm:$0xff]  ;;  %v1595_v4 = vld [vmem:[%s3496_s1 + $0x6b8] sm:$0xff]  ;;  %v1592_v7 = vld [vmem:[%s3496_s1 + $0x6a0] sm:$0xff] }
  0x23   : > { %v1594_v8 = vld [vmem:[%s3496_s1 + $0x6b0] sm:$0xff]  ;;  %v1597_v9 = vld [vmem:[%s3496_s1 + $0x6c8] sm:$0xff]  ;;  %v1599_v10 = vld [vmem:[%s3496_s1 + $0x6d8] sm:$0xff] }
  0x24   : > { %v1596_v13 = vld [vmem:[%s3496_s1 + $0x6c0] sm:$0xff]  ;;  %v1598_v14 = vld [vmem:[%s3496_s1 + $0x6d0] sm:$0xff]  ;;  %v1601_v15 = vld [vmem:[%s3496_s1 + $0x6e8] sm:$0xff] }
  0x25   : > { %1732 = vmatpush1.bf16.msra.mxu0 %v1731_v51  ;;  %v1771_v51 = vpack.c.bf16 %v1578_v48, %v1576_v47  ;;  %v1603_v16 = vld [vmem:[%s3496_s1 + $0x6f8] sm:$0xff]  ;;  %v1600_v19 = vld [vmem:[%s3496_s1 + $0x6e0] sm:$0xff]  ;;  %v1602_v20 = vld [vmem:[%s3496_s1 + $0x6f0] sm:$0xff] }
  0x26   : > { %1734 = vmatprep.subr.bf16.mxu0 %v1733_v52  ;;  %v1773_v52 = vpack.c.bf16 %v1583_v50, %v1581_v49  ;;  %v1605_v21 = vld [vmem:[%s3496_s1 + $0x708] sm:$0xff]  ;;  %v1607_v22 = vld [vmem:[%s3496_s1 + $0x718] sm:$0xff]  ;;  %v1604_v25 = vld [vmem:[%s3496_s1 + $0x700] sm:$0xff] }
  0x27   : > { %v1606_v26 = vld [vmem:[%s3496_s1 + $0x710] sm:$0xff]  ;;  %v1609_v27 = vld [vmem:[%s3496_s1 + $0x728] sm:$0xff]  ;;  %v1611_v28 = vld [vmem:[%s3496_s1 + $0x738] sm:$0xff] }
  0x28   : > { %v1608_v31 = vld [vmem:[%s3496_s1 + $0x720] sm:$0xff]  ;;  %v1610_v32 = vld [vmem:[%s3496_s1 + $0x730] sm:$0xff]  ;;  %v1613_v33 = vld [vmem:[%s3496_s1 + $0x748] sm:$0xff] }
  0x29   : > { %1736 = vmatpush1.bf16.msra.mxu0 %v1735_v57  ;;  %v1775_v57 = vpack.c.bf16 %v1582_v54, %v1580_v53  ;;  %v1615_v34 = vld [vmem:[%s3496_s1 + $0x758] sm:$0xff]  ;;  %v1614_v38 = vld [vmem:[%s3496_s1 + $0x750] sm:$0xff]  ;;  %v1617_v39 = vld [vmem:[%s3496_s1 + $0x768] sm:$0xff] }
  0x2a   : > { %1738 = vmatprep.subr.bf16.mxu0 %v1737_v58  ;;  %v1777_v58 = vpack.c.bf16 %v1587_v56, %v1585_v55  ;;  %v1805_v36 = vpack.c.bf16 %v1615_v34, %v1613_v33  ;;  %v1619_v40 = vld [vmem:[%s3496_s1 + $0x778] sm:$0xff]  ;;  %v1620_v49 = vld [vmem:[%s3496_s1 + $0x780] sm:$0xff]  ;;  %v1622_v50 = vld [vmem:[%s3496_s1 + $0x790] sm:$0xff] }
  0x2b   : > { %v1809_v42 = vpack.c.bf16 %v1619_v40, %v1617_v39  ;;  %v1815_v53 = vpack.c.bf16 %v1622_v50, %v1620_v49  ;;  %v1624_v55 = vld [vmem:[%s3496_s1 + $0x7a0] sm:$0xff]  ;;  %v1626_v56 = vld [vmem:[%s3496_s1 + $0x7b0] sm:$0xff]  ;;  %v335_v33 = vld [vmem:[%s3496_s1 + $0x78] sm:$0xff] }
  0x2c   : > { %v332_v39 = vld [vmem:[%s3496_s1 + $0x60] sm:$0xff]  ;;  %v334_v40 = vld [vmem:[%s3496_s1 + $0x70] sm:$0xff]  ;;  %v341_v50 = vld [vmem:[%s3496_s1 + $0xa8] sm:$0xff] }
  0x2d   : > { %1740 = vmatpush1.bf16.msra.mxu0 %v1739_v63  ;;  %v1779_v63 = vpack.c.bf16 %v1586_v60, %v1584_v59  ;;  %v1819_v59 = vpack.c.bf16 %v1626_v56, %v1624_v55  ;;  %v338_v49 = vld [vmem:[%s3496_s1 + $0x90] sm:$0xff] }
  0x2e   : > { %1742 = vmatprep.subr.bf16.mxu0 %v1741_v0  ;;  %v1781_v0 = vpack.c.bf16 %v1591_v62, %v1589_v61  ;;  %v1628_v61 = vld [vmem:[%s3496_s1 + $0x7c0] sm:$0xff]  ;;  %v1630_v62 = vld [vmem:[%s3496_s1 + $0x7d0] sm:$0xff] }
  0x31   : > { %1744 = vmatpush1.bf16.msra.mxu0 %v1743_v5  ;;  %v1783_v5 = vpack.c.bf16 %v1590_v2, %v1588_v1  ;;  %v1823_v1 = vpack.c.bf16 %v1630_v62, %v1628_v61  ;;  %v287_v62 = vld [vmem:[%s3498_s3 + $0x50] sm:$0xff] }
  0x32   : > { %1746 = vmatprep.subr.bf16.mxu0 %v1745_v6  ;;  %v1785_v6 = vpack.c.bf16 %v1595_v4, %v1593_v3  ;;  %v1632_v3 = vld [vmem:[%s3496_s1 + $0x7e0] sm:$0xff]  ;;  %v1634_v4 = vld [vmem:[%s3496_s1 + $0x7f0] sm:$0xff] }
  0x35   : > { %1748 = vmatpush1.bf16.msra.mxu0 %v1747_v11  ;;  %v1787_v11 = vpack.c.bf16 %v1594_v8, %v1592_v7  ;;  %v1827_v7 = vpack.c.bf16 %v1634_v4, %v1632_v3  ;;  %v450_v8 = vld [vmem:[%s2297_s16 + $0x10] sm:$0xfe]  ;;  %v349_v4 = vld [vmem:[%s3496_s1 + $0xe8] sm:$0xff] }
  0x36   : > { %1750 = vmatprep.subr.bf16.mxu0 %v1749_v12  ;;  %v1789_v12 = vpack.c.bf16 %v1599_v10, %v1597_v9  ;;  %v320_v10 = vld [vmem:[%s3496_s1] sm:$0xff]  ;;  %v346_v3 = vld [vmem:[%s3496_s1 + $0xd0] sm:$0xff] }
  0x39   : > { %1752 = vmatpush1.bf16.msra.mxu0 %v1751_v17  ;;  %v1791_v17 = vpack.c.bf16 %v1598_v14, %v1596_v13  ;;  %v327_v13 = vld [vmem:[%s3496_s1 + $0x38] sm:$0xff]  ;;  %v587_v14 = vrot.slane %v450_v8, 1  ;;  %v290_v8 = vld [vmem:[%s3498_s3 + $0x68] sm:$0xff] }
  0x3a   : > { %1754 = vmatprep.subr.bf16.mxu0 %v1753_v18  ;;  %v1793_v18 = vpack.c.bf16 %v1603_v16, %v1601_v15 }
  0x3d   : > { %1756 = vmatpush1.bf16.msra.mxu0 %v1755_v23  ;;  %v1795_v23 = vpack.c.bf16 %v1602_v20, %v1600_v19  ;;  %v317_v19 = vld [vmem:[%s2297_s16 + $0x8] sm:$0x7f] }
  0x3e   : > { %1758 = vmatprep.subr.bf16.mxu0 %v1757_v24  ;;  %v1797_v24 = vpack.c.bf16 %v1607_v22, %v1605_v21  ;;  %v329_v20 = vld [vmem:[%s3496_s1 + $0x48] sm:$0xff]  ;;  %v331_v21 = vld [vmem:[%s3496_s1 + $0x58] sm:$0xff]  ;;  %v277_v22 = vld [vmem:[%s3498_s3] sm:$0xff] }
  0x41   : > { %1760 = vmatpush1.bf16.msra.mxu0 %v1759_v29  ;;  %v1799_v29 = vpack.c.bf16 %v1606_v26, %v1604_v25 }
  0x42   : > { %1762 = vmatprep.subr.bf16.mxu0 %v1761_v30  ;;  %v1801_v30 = vpack.c.bf16 %v1611_v28, %v1609_v27  ;;  %v280_v27 = vld [vmem:[%s3498_s3 + $0x18] sm:$0xff]  ;;  %v1837_v28 = vpack.c.bf16 %v331_v21, %v329_v20  ;;  %v352_v20 = vld [vmem:[%s3496_s1 + $0x100] sm:$0xff]  ;;  %v354_v21 = vld [vmem:[%s3496_s1 + $0x110] sm:$0xff] }
  0x45   : > { %1764 = vmatpush1.bf16.msra.mxu0 %v1763_v35  ;;  %v1803_v35 = vpack.c.bf16 %v1610_v32, %v1608_v31  ;;  %v2159_v31 = vmov 0.0|0.0   ;;  %v333_v32 = vld [vmem:[%s3496_s1 + $0x68] sm:$0xff] }
  0x46   : > { %1766 = vmatprep.subr.bf16.mxu0 %v1765_v37  ;;  %v1612_v37 = vld [vmem:[%s3496_s1 + $0x740] sm:$0xff]  ;;  %1957 = vmatprep.subr.bf16.mxu1 %v2159_v31 }
  0x47   : > { %v1807_v41 = vpack.c.bf16 %v1614_v38, %v1612_v37  ;;  %v1841_v38 = vpack.c.bf16 %v335_v33, %v333_v32  ;;  %v361_v32 = vld [vmem:[%s3496_s1 + $0x148] sm:$0xff]  ;;  %v363_v33 = vld [vmem:[%s3496_s1 + $0x158] sm:$0xff] }
  0x48   : > { %658 = vmatmul.mubr.f32.vlgmr.msra.gmra.mrb[0].mxu0 %v585_v43  ;;  %v1616_v43 = vld [vmem:[%s3496_s1 + $0x760] sm:$0xff] }
  0x49   : > { %1768 = vmatpush1.bf16.msra.mxu0 %v1767_v44  ;;  %728 = vmatprep.mubr.f32.mxu0 %v588_v45  ;;  %v1618_v44 = vld [vmem:[%s3496_s1 + $0x770] sm:$0xff]  ;;  %v1621_v45 = vld [vmem:[%s3496_s1 + $0x788] sm:$0xff] }
  0x4a   : > { %1770 = vmatprep.subr.bf16.mxu0 %v1769_v46  ;;  %v1623_v46 = vld [vmem:[%s3496_s1 + $0x798] sm:$0xff]  ;;  %v1811_v47 = vpack.c.bf16 %v1618_v44, %v1616_v43  ;;  %v283_v44 = vld [vmem:[%s3498_s3 + $0x30] sm:$0xff] }
  0x4b   : > { %v1813_v48 = vpack.c.bf16 %v1623_v46, %v1621_v45  ;;  %v284_v45 = vld [vmem:[%s3498_s3 + $0x38] sm:$0xff]  ;;  %v1843_v46 = vpack.c.bf16 %v334_v40, %v332_v39  ;;  %v365_v39 = vld [vmem:[%s3496_s1 + $0x168] sm:$0xff] }
  0x4c   : > { %v367_v40 = vld [vmem:[%s3496_s1 + $0x178] sm:$0xff] }
  0x4d   : > { %1772 = vmatpush1.bf16.msra.mxu0 %v1771_v51  ;;  %v1625_v51 = vld [vmem:[%s3496_s1 + $0x7a8] sm:$0xff] }
  0x4e   : > { %1774 = vmatprep.subr.bf16.mxu0 %v1773_v52  ;;  %v1627_v52 = vld [vmem:[%s3496_s1 + $0x7b8] sm:$0xff] }
  0x4f   : > { %v1817_v54 = vpack.c.bf16 %v1627_v52, %v1625_v51  ;;  %v343_v51 = vld [vmem:[%s3496_s1 + $0xb8] sm:$0xff]  ;;  %v1967_v52 = vpack.c.bf16 %v284_v45, %v283_v44  ;;  %v366_v44 = vld [vmem:[%s3496_s1 + $0x170] sm:$0xff]  ;;  %v369_v45 = vld [vmem:[%s3496_s1 + $0x188] sm:$0xff] }
  0x50   : > { %v1849_v56 = vpack.c.bf16 %v343_v51, %v341_v50  ;;  %v370_v50 = vld [vmem:[%s3496_s1 + $0x190] sm:$0xff]  ;;  %v373_v51 = vld [vmem:[%s3496_s1 + $0x1a8] sm:$0xff] }
  0x51   : > { %1776 = vmatpush1.bf16.msra.mxu0 %v1775_v57  ;;  %v1629_v57 = vld [vmem:[%s3496_s1 + $0x7c8] sm:$0xff] }
  0x52   : > { %1778 = vmatprep.subr.bf16.mxu0 %v1777_v58  ;;  %v1631_v58 = vld [vmem:[%s3496_s1 + $0x7d8] sm:$0xff] }
  0x53   : > { %v1821_v60 = vpack.c.bf16 %v1631_v58, %v1629_v57  ;;  %v340_v57 = vld [vmem:[%s3496_s1 + $0xa0] sm:$0xff]  ;;  %v342_v58 = vld [vmem:[%s3496_s1 + $0xb0] sm:$0xff] }
  0x55   : > { %1780 = vmatpush1.bf16.msra.mxu0 %v1779_v63  ;;  %v1633_v63 = vld [vmem:[%s3496_s1 + $0x7e8] sm:$0xff] }
  0x56   : > { %1782 = vmatprep.subr.bf16.mxu0 %v1781_v0  ;;  %v1635_v0 = vld [vmem:[%s3496_s1 + $0x7f8] sm:$0xff] }
  0x57   : > { %v1825_v2 = vpack.c.bf16 %v1635_v0, %v1633_v63  ;;  %v288_v63 = vld [vmem:[%s3498_s3 + $0x58] sm:$0xff]  ;;  %v1851_v0 = vpack.c.bf16 %v342_v58, %v340_v57  ;;  %v377_v57 = vld [vmem:[%s3496_s1 + $0x1c8] sm:$0xff] }
  0x58   : > { %v379_v58 = vld [vmem:[%s3496_s1 + $0x1d8] sm:$0xff] }
  0x59   : > { %1784 = vmatpush1.bf16.msra.mxu0 %v1783_v5  ;;  %v321_v5 = vld [vmem:[%s3496_s1 + $0x8] sm:$0xff] }
  0x5a   : > { %1786 = vmatprep.subr.bf16.mxu0 %v1785_v6  ;;  %v323_v6 = vld [vmem:[%s3496_s1 + $0x18] sm:$0xff] }
  0x5b   : > { %v1829_v9 = vpack.c.bf16 %v323_v6, %v321_v5  ;;  %v351_v5 = vld [vmem:[%s3496_s1 + $0xf8] sm:$0xff]  ;;  %v1973_v6 = vpack.c.bf16 %v288_v63, %v287_v62  ;;  %v378_v62 = vld [vmem:[%s3496_s1 + $0x1d0] sm:$0xff]  ;;  %v381_v63 = vld [vmem:[%s3496_s1 + $0x1e8] sm:$0xff] }
  0x5d   : > { %1788 = vmatpush1.bf16.msra.mxu0 %v1787_v11  ;;  %v322_v11 = vld [vmem:[%s3496_s1 + $0x10] sm:$0xff] }
  0x5e   : > { %1790 = vmatprep.subr.bf16.mxu0 %v1789_v12  ;;  %v325_v12 = vld [vmem:[%s3496_s1 + $0x28] sm:$0xff]  ;;  %v1831_v15 = vpack.c.bf16 %v322_v11, %v320_v10  ;;  %v1857_v10 = vpack.c.bf16 %v351_v5, %v349_v4  ;;  %v348_v11 = vld [vmem:[%s3496_s1 + $0xe0] sm:$0xff]  ;;  %v382_v4 = vld [vmem:[%s3496_s1 + $0x1f0] sm:$0xff] }
  0x5f   : > { %v1833_v16 = vpack.c.bf16 %v327_v13, %v325_v12  ;;  %v350_v12 = vld [vmem:[%s3496_s1 + $0xf0] sm:$0xff]  ;;  %v353_v13 = vld [vmem:[%s3496_s1 + $0x108] sm:$0xff] }
  0x60   : > { %v385_v5 = vld [vmem:[%s3496_s1 + $0x208] sm:$0xff] }
  0x61   : > { %1792 = vmatpush1.bf16.msra.mxu0 %v1791_v17  ;;  %v324_v17 = vld [vmem:[%s3496_s1 + $0x20] sm:$0xff] }
  0x62   : > { %1794 = vmatprep.subr.bf16.mxu0 %v1793_v18  ;;  %v326_v18 = vld [vmem:[%s3496_s1 + $0x30] sm:$0xff] }
  0x63   : > { %v1835_v25 = vpack.c.bf16 %v326_v18, %v324_v17  ;;  %v292_v17 = vld [vmem:[%s3498_s3 + $0x78] sm:$0xff]  ;;  %v1859_v18 = vpack.c.bf16 %v350_v12, %v348_v11  ;;  %v389_v11 = vld [vmem:[%s3496_s1 + $0x228] sm:$0xff] }
  0x64   : > { %v391_v12 = vld [vmem:[%s3496_s1 + $0x238] sm:$0xff] }
  0x65   : > { %1796 = vmatpush1.bf16.msra.mxu0 %v1795_v23  ;;  %v278_v23 = vld [vmem:[%s3498_s3 + $0x8] sm:$0xff] }
  0x66   : > { %1798 = vmatprep.subr.bf16.mxu0 %v1797_v24  ;;  %v279_v24 = vld [vmem:[%s3498_s3 + $0x10] sm:$0xff]  ;;  %v1958_v26 = vpack.c.bf16 %v278_v23, %v277_v22  ;;  %v357_v22 = vld [vmem:[%s3496_s1 + $0x128] sm:$0xff]  ;;  %v359_v23 = vld [vmem:[%s3496_s1 + $0x138] sm:$0xff] }
  0x67   : > { %v1961_v34 = vpack.c.bf16 %v280_v27, %v279_v24  ;;  %v1863_v27 = vpack.c.bf16 %v354_v21, %v352_v20  ;;  %v395_v20 = vld [vmem:[%s3496_s1 + $0x258] sm:$0xff] }
  0x68   : > { %1959 = vmatpush1.bf16.msra.mxu1 %v1958_v26  ;;  %v294_v26 = vld [vmem:[%s3498_s3 + $0x88] sm:$0xff] }
  0x69   : > { %1800 = vmatpush1.bf16.msra.mxu0 %v1799_v29  ;;  %v328_v29 = vld [vmem:[%s3496_s1 + $0x40] sm:$0xff]  ;;  %1960 = vmatprep.subr.bf16.mxu1 %v2159_v31 }
  0x6a   : > { %1802 = vmatprep.subr.bf16.mxu0 %v1801_v30  ;;  %v330_v30 = vld [vmem:[%s3496_s1 + $0x50] sm:$0xff] }
  0x6b   : > { %v1839_v37 = vpack.c.bf16 %v330_v30, %v328_v29  ;;  %v356_v29 = vld [vmem:[%s3496_s1 + $0x120] sm:$0xff]  ;;  %v358_v30 = vld [vmem:[%s3496_s1 + $0x130] sm:$0xff] }
  0x6c   : > { %1962 = vmatpush1.bf16.msra.mxu1 %v1961_v34 }
  0x6d   : > { %1804 = vmatpush1.bf16.msra.mxu0 %v1803_v35  ;;  %v281_v35 = vld [vmem:[%s3498_s3 + $0x20] sm:$0xff]  ;;  %1963 = vmatprep.subr.bf16.mxu1 %v2159_v31 }
  0x6e   : > { %1806 = vmatprep.subr.bf16.mxu0 %v1805_v36  ;;  %v282_v36 = vld [vmem:[%s3498_s3 + $0x28] sm:$0xff] }
  0x6f   : > { %v1964_v43 = vpack.c.bf16 %v282_v36, %v281_v35  ;;  %v1867_v35 = vpack.c.bf16 %v358_v30, %v356_v29  ;;  %v1869_v36 = vpack.c.bf16 %v363_v33, %v361_v32  ;;  %v396_v29 = vld [vmem:[%s3496_s1 + $0x260] sm:$0xff]  ;;  %v398_v30 = vld [vmem:[%s3496_s1 + $0x270] sm:$0xff]  ;;  %v401_v32 = vld [vmem:[%s3496_s1 + $0x288] sm:$0xff] }
  0x70   : > { %v403_v33 = vld [vmem:[%s3496_s1 + $0x298] sm:$0xff] }
  0x71   : > { %1808 = vmatpush1.bf16.msra.mxu0 %v1807_v41  ;;  %v337_v41 = vld [vmem:[%s3496_s1 + $0x88] sm:$0xff]  ;;  %1965 = vmatpush1.bf16.msra.mxu1 %v1964_v43  ;;  %v364_v43 = vld [vmem:[%s3496_s1 + $0x160] sm:$0xff] }
  0x72   : > { %1810 = vmatprep.subr.bf16.mxu0 %v1809_v42  ;;  %v339_v42 = vld [vmem:[%s3496_s1 + $0x98] sm:$0xff]  ;;  %1966 = vmatprep.subr.bf16.mxu1 %v2159_v31 }
  0x75   : > { %1812 = vmatpush1.bf16.msra.mxu0 %v1811_v47  ;;  %v1845_v47 = vpack.c.bf16 %v339_v42, %v337_v41  ;;  %1968 = vmatpush1.bf16.msra.mxu1 %v1967_v52  ;;  %v1873_v42 = vpack.c.bf16 %v367_v40, %v365_v39  ;;  %v375_v52 = vld [vmem:[%s3496_s1 + $0x1b8] sm:$0xff] }
  0x76   : > { %1814 = vmatprep.subr.bf16.mxu0 %v1813_v48  ;;  %v336_v48 = vld [vmem:[%s3496_s1 + $0x80] sm:$0xff]  ;;  %1969 = vmatprep.subr.bf16.mxu1 %v2159_v31  ;;  %v407_v39 = vld [vmem:[%s3496_s1 + $0x2b8] sm:$0xff] }
  0x77   : > { %v1847_v55 = vpack.c.bf16 %v338_v49, %v336_v48  ;;  %v368_v49 = vld [vmem:[%s3496_s1 + $0x180] sm:$0xff] }
  0x79   : > { %1816 = vmatpush1.bf16.msra.mxu0 %v1815_v53  ;;  %v285_v53 = vld [vmem:[%s3498_s3 + $0x40] sm:$0xff] }
  0x7a   : > { %1818 = vmatprep.subr.bf16.mxu0 %v1817_v54  ;;  %v286_v54 = vld [vmem:[%s3498_s3 + $0x48] sm:$0xff] }
  0x7b   : > { %v1970_v61 = vpack.c.bf16 %v286_v54, %v285_v53  ;;  %v1879_v53 = vpack.c.bf16 %v370_v50, %v368_v49  ;;  %v1881_v54 = vpack.c.bf16 %v375_v52, %v373_v51  ;;  %v410_v49 = vld [vmem:[%s3496_s1 + $0x2d0] sm:$0xff]  ;;  %v413_v50 = vld [vmem:[%s3496_s1 + $0x2e8] sm:$0xff]  ;;  %v415_v51 = vld [vmem:[%s3496_s1 + $0x2f8] sm:$0xff] }
  0x7d   : > { %1820 = vmatpush1.bf16.msra.mxu0 %v1819_v59  ;;  %v345_v59 = vld [vmem:[%s3496_s1 + $0xc8] sm:$0xff]  ;;  %1971 = vmatpush1.bf16.msra.mxu1 %v1970_v61  ;;  %v376_v61 = vld [vmem:[%s3496_s1 + $0x1c0] sm:$0xff] }
  0x7e   : > { %1822 = vmatprep.subr.bf16.mxu0 %v1821_v60  ;;  %v347_v60 = vld [vmem:[%s3496_s1 + $0xd8] sm:$0xff]  ;;  %1972 = vmatprep.subr.bf16.mxu1 %v2159_v31 }
  0x81   : > { %1824 = vmatpush1.bf16.msra.mxu0 %v1823_v1  ;;  %v1853_v1 = vpack.c.bf16 %v347_v60, %v345_v59  ;;  %1974 = vmatpush1.bf16.msra.mxu1 %v1973_v6  ;;  %v1885_v60 = vpack.c.bf16 %v379_v58, %v377_v57  ;;  %v387_v6 = vld [vmem:[%s3496_s1 + $0x218] sm:$0xff] }
  0x82   : > { %1826 = vmatprep.subr.bf16.mxu0 %v1825_v2  ;;  %v344_v2 = vld [vmem:[%s3496_s1 + $0xc0] sm:$0xff]  ;;  %1975 = vmatprep.subr.bf16.mxu1 %v2159_v31  ;;  %v419_v57 = vld [vmem:[%s3496_s1 + $0x318] sm:$0xff] }
  0x85   : > { %1828 = vmatpush1.bf16.msra.mxu0 %v1827_v7  ;;  %v289_v7 = vld [vmem:[%s3498_s3 + $0x60] sm:$0xff] }
  0x86   : > { %1830 = vmatprep.subr.bf16.mxu0 %v1829_v9  ;;  %v1855_v9 = vpack.c.bf16 %v346_v3, %v344_v2  ;;  %v380_v3 = vld [vmem:[%s3496_s1 + $0x1e0] sm:$0xff] }
  0x88   : > { %729 = vmatmul.mubr.f32.vlgmr.msra.gmra.mrb[0].mxu0 %v587_v14  ;;  %v355_v14 = vld [vmem:[%s3496_s1 + $0x118] sm:$0xff] }
  0x89   : > { %1832 = vmatpush1.bf16.msra.mxu0 %v1831_v15  ;;  %799 = vmatprep.mubr.f32.mxu0 %v317_v19  ;;  %v1976_v15 = vpack.c.bf16 %v290_v8, %v289_v7  ;;  %v1861_v19 = vpack.c.bf16 %v355_v14, %v353_v13  ;;  %v1891_v7 = vpack.c.bf16 %v382_v4, %v380_v3  ;;  %v316_v13 = vld [vmem:[%s2297_s16] sm:$0x7f]  ;;  %v422_v3 = vld [vmem:[%s3496_s1 + $0x330] sm:$0xff]  ;;  %v425_v4 = vld [vmem:[%s3496_s1 + $0x348] sm:$0xff] }
  0x8a   : > { %1834 = vmatprep.subr.bf16.mxu0 %v1833_v16  ;;  %v291_v16 = vld [vmem:[%s3498_s3 + $0x70] sm:$0xff]  ;;  %v1893_v8 = vpack.c.bf16 %v387_v6, %v385_v5  ;;  %v427_v5 = vld [vmem:[%s3496_s1 + $0x358] sm:$0xff] }
  0x8b   : > { %1977 = vmatpush1.bf16.msra.mxu1 %v1976_v15  ;;  %v1979_v24 = vpack.c.bf16 %v292_v17, %v291_v16  ;;  %v1897_v15 = vpack.c.bf16 %v391_v12, %v389_v11  ;;  %v388_v16 = vld [vmem:[%s3496_s1 + $0x220] sm:$0xff]  ;;  %v390_v17 = vld [vmem:[%s3496_s1 + $0x230] sm:$0xff]  ;;  %v431_v11 = vld [vmem:[%s3496_s1 + $0x378] sm:$0xff] }
  0x8c   : > { %1978 = vmatprep.subr.bf16.mxu1 %v2159_v31  ;;  %v1899_v21 = vpack.c.bf16 %v390_v17, %v388_v16  ;;  %v433_v16 = vld [vmem:[%s3496_s1 + $0x388] sm:$0xff]  ;;  %v435_v17 = vld [vmem:[%s3496_s1 + $0x398] sm:$0xff] }
  0x8d   : > { %1836 = vmatpush1.bf16.msra.mxu0 %v1835_v25  ;;  %v293_v25 = vld [vmem:[%s3498_s3 + $0x80] sm:$0xff] }
  0x8e   : > { %1838 = vmatprep.subr.bf16.mxu0 %v1837_v28  ;;  %v1865_v28 = vpack.c.bf16 %v359_v23, %v357_v22  ;;  %v1982_v34 = vpack.c.bf16 %v294_v26, %v293_v25  ;;  %v392_v23 = vld [vmem:[%s3496_s1 + $0x240] sm:$0xff]  ;;  %v397_v25 = vld [vmem:[%s3496_s1 + $0x268] sm:$0xff]  ;;  %v399_v26 = vld [vmem:[%s3496_s1 + $0x278] sm:$0xff] }
  0x8f   : > { %1980 = vmatpush1.bf16.msra.mxu1 %v1979_v24  ;;  %v394_v24 = vld [vmem:[%s3496_s1 + $0x250] sm:$0xff] }
  0x90   : > { %1981 = vmatprep.subr.bf16.mxu1 %v2159_v31 }
  0x91   : > { %1840 = vmatpush1.bf16.msra.mxu0 %v1839_v37  ;;  %v360_v37 = vld [vmem:[%s3496_s1 + $0x140] sm:$0xff] }
  0x92   : > { %1842 = vmatprep.subr.bf16.mxu0 %v1841_v38  ;;  %v362_v38 = vld [vmem:[%s3496_s1 + $0x150] sm:$0xff] }
  0x93   : > { %1983 = vmatpush1.bf16.msra.mxu1 %v1982_v34  ;;  %v1871_v41 = vpack.c.bf16 %v362_v38, %v360_v37  ;;  %v1907_v34 = vpack.c.bf16 %v398_v30, %v396_v29  ;;  %v402_v37 = vld [vmem:[%s3496_s1 + $0x290] sm:$0xff]  ;;  %v405_v38 = vld [vmem:[%s3496_s1 + $0x2a8] sm:$0xff]  ;;  %v443_v29 = vld [vmem:[%s3496_s1 + $0x3d8] sm:$0xff] }
  0x94   : > { %1984 = vmatprep.subr.bf16.mxu1 %v2159_v31 }
  0x95   : > { %1844 = vmatpush1.bf16.msra.mxu0 %v1843_v46  ;;  %v371_v46 = vld [vmem:[%s3496_s1 + $0x198] sm:$0xff] }
  0x96   : > { %1846 = vmatprep.subr.bf16.mxu0 %v1845_v47  ;;  %v1875_v47 = vpack.c.bf16 %v366_v44, %v364_v43  ;;  %v1877_v48 = vpack.c.bf16 %v371_v46, %v369_v45  ;;  %v406_v43 = vld [vmem:[%s3496_s1 + $0x2b0] sm:$0xff]  ;;  %v409_v44 = vld [vmem:[%s3496_s1 + $0x2c8] sm:$0xff]  ;;  %v411_v45 = vld [vmem:[%s3496_s1 + $0x2d8] sm:$0xff] }
  0x99   : > { %1848 = vmatpush1.bf16.msra.mxu0 %v1847_v55  ;;  %v372_v55 = vld [vmem:[%s3496_s1 + $0x1a0] sm:$0xff] }
  0x9a   : > { %1850 = vmatprep.subr.bf16.mxu0 %v1849_v56  ;;  %v374_v56 = vld [vmem:[%s3496_s1 + $0x1b0] sm:$0xff] }
  0x9b   : > { %v1883_v59 = vpack.c.bf16 %v374_v56, %v372_v55  ;;  %v414_v55 = vld [vmem:[%s3496_s1 + $0x2f0] sm:$0xff]  ;;  %v417_v56 = vld [vmem:[%s3496_s1 + $0x308] sm:$0xff] }
  0x9d   : > { %1852 = vmatpush1.bf16.msra.mxu0 %v1851_v0  ;;  %v383_v0 = vld [vmem:[%s3496_s1 + $0x1f8] sm:$0xff] }
  0x9e   : > { %1854 = vmatprep.subr.bf16.mxu0 %v1853_v1  ;;  %v1887_v1 = vpack.c.bf16 %v378_v62, %v376_v61  ;;  %v1889_v2 = vpack.c.bf16 %v383_v0, %v381_v63  ;;  %v418_v61 = vld [vmem:[%s3496_s1 + $0x310] sm:$0xff]  ;;  %v421_v62 = vld [vmem:[%s3496_s1 + $0x328] sm:$0xff]  ;;  %v423_v63 = vld [vmem:[%s3496_s1 + $0x338] sm:$0xff] }
  0xa1   : > { %1856 = vmatpush1.bf16.msra.mxu0 %v1855_v9  ;;  %v384_v9 = vld [vmem:[%s3496_s1 + $0x200] sm:$0xff] }
  0xa2   : > { %1858 = vmatprep.subr.bf16.mxu0 %v1857_v10  ;;  %v386_v10 = vld [vmem:[%s3496_s1 + $0x210] sm:$0xff] }
  0xa3   : > { %v1895_v14 = vpack.c.bf16 %v386_v10, %v384_v9  ;;  %v426_v9 = vld [vmem:[%s3496_s1 + $0x350] sm:$0xff]  ;;  %v429_v10 = vld [vmem:[%s3496_s1 + $0x368] sm:$0xff] }
  0xa5   : > { %1860 = vmatpush1.bf16.msra.mxu0 %v1859_v18  ;;  %v319_v18 = vld [vmem:[%s2297_s16 + $0x18] sm:$0x7f] }
  0xa6   : > { %1862 = vmatprep.subr.bf16.mxu0 %v1861_v19  ;;  %v393_v19 = vld [vmem:[%s3496_s1 + $0x248] sm:$0xff] }
  0xa7   : > { %v1901_v22 = vpack.c.bf16 %v395_v20, %v393_v19  ;;  %v1941_v19 = vpack.c.bf16 %v435_v17, %v433_v16  ;;  %v432_v20 = vld [vmem:[%s3496_s1 + $0x380] sm:$0xff] }
  0xa9   : > { %1864 = vmatpush1.bf16.msra.mxu0 %v1863_v27  ;;  %v1903_v27 = vpack.c.bf16 %v394_v24, %v392_v23  ;;  %v439_v23 = vld [vmem:[%s3496_s1 + $0x3b8] sm:$0xff] }
  0xaa   : > { %1866 = vmatprep.subr.bf16.mxu0 %v1865_v28  ;;  %v1905_v28 = vpack.c.bf16 %v399_v26, %v397_v25  ;;  %v436_v26 = vld [vmem:[%s3496_s1 + $0x3a0] sm:$0xff] }
  0xad   : > { %1868 = vmatpush1.bf16.msra.mxu0 %v1867_v35  ;;  %v1909_v35 = vpack.c.bf16 %v403_v33, %v401_v32  ;;  %v440_v33 = vld [vmem:[%s3496_s1 + $0x3c0] sm:$0xff] }
  0xae   : > { %1870 = vmatprep.subr.bf16.mxu0 %v1869_v36  ;;  %v400_v36 = vld [vmem:[%s3496_s1 + $0x280] sm:$0xff] }
  0xaf   : > { %v1911_v40 = vpack.c.bf16 %v402_v37, %v400_v36  ;;  %v447_v36 = vld [vmem:[%s3496_s1 + $0x3f8] sm:$0xff] }
  0xb1   : > { %1872 = vmatpush1.bf16.msra.mxu0 %v1871_v41  ;;  %v1913_v41 = vpack.c.bf16 %v407_v39, %v405_v38  ;;  %v444_v39 = vld [vmem:[%s3496_s1 + $0x3e0] sm:$0xff] }
  0xb2   : > { %1874 = vmatprep.subr.bf16.mxu0 %v1873_v42  ;;  %v404_v42 = vld [vmem:[%s3496_s1 + $0x2a0] sm:$0xff] }
  0xb3   : > { %v1915_v46 = vpack.c.bf16 %v406_v43, %v404_v42  ;;  %v318_v42 = vld [vmem:[%s2297_s16 + $0x10] sm:$0x7f] }
  0xb4   : > { %v295_v43 = vld [vmem:[%s3498_s3 + $0x90] sm:$0xff] }
  0xb5   : > { %1876 = vmatpush1.bf16.msra.mxu0 %v1875_v47  ;;  %v1917_v47 = vpack.c.bf16 %v411_v45, %v409_v44  ;;  %v296_v44 = vld [vmem:[%s3498_s3 + $0x98] sm:$0xff] }
  0xb6   : > { %1878 = vmatprep.subr.bf16.mxu0 %v1877_v48  ;;  %v408_v48 = vld [vmem:[%s3496_s1 + $0x2c0] sm:$0xff]  ;;  %v1985_v45 = vpack.c.bf16 %v296_v44, %v295_v43 }
  0xb7   : > { %v1919_v52 = vpack.c.bf16 %v410_v49, %v408_v48  ;;  %v299_v49 = vld [vmem:[%s3498_s3 + $0xb0] sm:$0xff] }
  0xb8   : > { %1986 = vmatpush1.bf16.msra.mxu1 %v1985_v45 }
  0xb9   : > { %1880 = vmatpush1.bf16.msra.mxu0 %v1879_v53  ;;  %v1921_v53 = vpack.c.bf16 %v415_v51, %v413_v50  ;;  %1987 = vmatprep.subr.bf16.mxu1 %v2159_v31  ;;  %v300_v50 = vld [vmem:[%s3498_s3 + $0xb8] sm:$0xff] }
  0xba   : > { %1882 = vmatprep.subr.bf16.mxu0 %v1881_v54  ;;  %v412_v54 = vld [vmem:[%s3496_s1 + $0x2e0] sm:$0xff]  ;;  %v1991_v51 = vpack.c.bf16 %v300_v50, %v299_v49 }
  0xbb   : > { %v1923_v58 = vpack.c.bf16 %v414_v55, %v412_v54  ;;  %v303_v55 = vld [vmem:[%s3498_s3 + $0xd0] sm:$0xff]  ;;  %v313_v50 = vld [vmem:[%s3500_s5] sm:$0x1] }
  0xbd   : > { %1884 = vmatpush1.bf16.msra.mxu0 %v1883_v59  ;;  %v1925_v59 = vpack.c.bf16 %v419_v57, %v417_v56  ;;  %v304_v56 = vld [vmem:[%s3498_s3 + $0xd8] sm:$0xff] }
  0xbe   : > { %1886 = vmatprep.subr.bf16.mxu0 %v1885_v60  ;;  %v416_v60 = vld [vmem:[%s3496_s1 + $0x300] sm:$0xff]  ;;  %v1997_v57 = vpack.c.bf16 %v304_v56, %v303_v55  ;;  %v1639_v56 = vld [vmem:[%s3497_s2 + $0xe8] sm:$0xff] }
  0xbf   : > { %v1927_v0 = vpack.c.bf16 %v418_v61, %v416_v60  ;;  %v1638_v55 = vld [vmem:[%s3497_s2 + $0xe0] sm:$0xff] }
  0xc1   : > { %1888 = vmatpush1.bf16.msra.mxu0 %v1887_v1  ;;  %v1929_v1 = vpack.c.bf16 %v423_v63, %v421_v62 }
  0xc2   : > { %1890 = vmatprep.subr.bf16.mxu0 %v1889_v2  ;;  %v420_v2 = vld [vmem:[%s3496_s1 + $0x320] sm:$0xff] }
  0xc3   : > { %v1931_v6 = vpack.c.bf16 %v422_v3, %v420_v2 }
  0xc5   : > { %1892 = vmatpush1.bf16.msra.mxu0 %v1891_v7  ;;  %v1933_v7 = vpack.c.bf16 %v427_v5, %v425_v4 }
  0xc6   : > { %1894 = vmatprep.subr.bf16.mxu0 %v1893_v8  ;;  %v424_v8 = vld [vmem:[%s3496_s1 + $0x340] sm:$0xff] }
  0xc7   : > { %v1935_v12 = vpack.c.bf16 %v426_v9, %v424_v8 }
  0xc8   : > { %800 = vmatmul.mubr.f32.vlgmr.msra.gmra.mrb[0].mxu0 %v316_v13  ;;  %v1937_v13 = vpack.c.bf16 %v431_v11, %v429_v10 }
  0xc9   : > { %1896 = vmatpush1.bf16.msra.mxu0 %v1895_v14  ;;  %870 = vmatprep.mubr.f32.mxu0 %v319_v18  ;;  %v428_v14 = vld [vmem:[%s3496_s1 + $0x360] sm:$0xff] }
  0xca   : > { %1898 = vmatprep.subr.bf16.mxu0 %v1897_v15  ;;  %v430_v15 = vld [vmem:[%s3496_s1 + $0x370] sm:$0xff] }
  0xcb   : > { %v1939_v18 = vpack.c.bf16 %v430_v15, %v428_v14 }
  0xcd   : > { %1900 = vmatpush1.bf16.msra.mxu0 %v1899_v21  ;;  %v434_v21 = vld [vmem:[%s3496_s1 + $0x390] sm:$0xff] }
  0xce   : > { %1902 = vmatprep.subr.bf16.mxu0 %v1901_v22  ;;  %v437_v22 = vld [vmem:[%s3496_s1 + $0x3a8] sm:$0xff]  ;;  %v1943_v24 = vpack.c.bf16 %v434_v21, %v432_v20 }
  0xcf   : > { %v1945_v25 = vpack.c.bf16 %v439_v23, %v437_v22 }
  0xd1   : > { %1904 = vmatpush1.bf16.msra.mxu0 %v1903_v27  ;;  %v438_v27 = vld [vmem:[%s3496_s1 + $0x3b0] sm:$0xff] }
  0xd2   : > { %1906 = vmatprep.subr.bf16.mxu0 %v1905_v28  ;;  %v441_v28 = vld [vmem:[%s3496_s1 + $0x3c8] sm:$0xff]  ;;  %v1947_v30 = vpack.c.bf16 %v438_v27, %v436_v26 }
  0xd3   : > { %v1949_v32 = vpack.c.bf16 %v443_v29, %v441_v28  ;;  %v306_v28 = vld [vmem:[%s3499_s4 + $0x8] sm:$0xff]  ;;  %v308_v29 = vld [vmem:[%s3499_s4 + $0x18] sm:$0xff] }
  0xd5   : > { %1908 = vmatpush1.bf16.msra.mxu0 %v1907_v34  ;;  %v442_v34 = vld [vmem:[%s3496_s1 + $0x3d0] sm:$0xff] }
  0xd6   : > { %1910 = vmatprep.subr.bf16.mxu0 %v1909_v35  ;;  %v445_v35 = vld [vmem:[%s3496_s1 + $0x3e8] sm:$0xff]  ;;  %v1951_v37 = vpack.c.bf16 %v442_v34, %v440_v33  ;;  %v307_v33 = vld [vmem:[%s3499_s4 + $0x10] sm:$0xff] }
  0xd7   : > { %v1953_v38 = vpack.c.bf16 %v447_v36, %v445_v35  ;;  %v310_v35 = vld [vmem:[%s3499_s4 + $0x28] sm:$0xff]  ;;  %v312_v36 = vld [vmem:[%s3499_s4 + $0x38] sm:$0xff] }
  0xd9   : > { %1912 = vmatpush1.bf16.msra.mxu0 %v1911_v40  ;;  %v446_v40 = vld [vmem:[%s3496_s1 + $0x3f0] sm:$0xff] }
  0xda   : > { %1914 = vmatprep.subr.bf16.mxu0 %v1913_v41  ;;  %v1955_v41 = vpack.c.bf16 %v446_v40, %v444_v39  ;;  %v311_v39 = vld [vmem:[%s3499_s4 + $0x30] sm:$0xff] }
  0xdd   : > { %1916 = vmatpush1.bf16.msra.mxu0 %v1915_v46  ;;  %v297_v46 = vld [vmem:[%s3498_s3 + $0xa0] sm:$0xff] }
  0xde   : > { %1918 = vmatprep.subr.bf16.mxu0 %v1917_v47  ;;  %v298_v47 = vld [vmem:[%s3498_s3 + $0xa8] sm:$0xff] }
  0xdf   : > { %v1988_v48 = vpack.c.bf16 %v298_v47, %v297_v46 }
  0xe1   : > { %1920 = vmatpush1.bf16.msra.mxu0 %v1919_v52  ;;  %1989 = vmatpush1.bf16.msra.mxu1 %v1988_v48  ;;  %v301_v52 = vld [vmem:[%s3498_s3 + $0xc0] sm:$0xff] }
  0xe2   : > { %1922 = vmatprep.subr.bf16.mxu0 %v1921_v53  ;;  %1990 = vmatprep.subr.bf16.mxu1 %v2159_v31  ;;  %v302_v53 = vld [vmem:[%s3498_s3 + $0xc8] sm:$0xff] }
  0xe3   : > { %v1994_v54 = vpack.c.bf16 %v302_v53, %v301_v52  ;;  %v314_v53 = vld [vmem:[%s3500_s5 + $0x1] sm:$0x1] }
  0xe5   : > { %1924 = vmatpush1.bf16.msra.mxu0 %v1923_v58  ;;  %1992 = vmatpush1.bf16.msra.mxu1 %v1991_v51 }
  0xe6   : > { %1926 = vmatprep.subr.bf16.mxu0 %v1925_v59  ;;  %1993 = vmatprep.subr.bf16.mxu1 %v2159_v31 }
  0xe9   : > { %1928 = vmatpush1.bf16.msra.mxu0 %v1927_v0  ;;  %1995 = vmatpush1.bf16.msra.mxu1 %v1994_v54 }
  0xea   : > { %1930 = vmatprep.subr.bf16.mxu0 %v1929_v1  ;;  %1996 = vmatprep.subr.bf16.mxu1 %v2159_v31 }
  0xed   : > { %1932 = vmatpush1.bf16.msra.mxu0 %v1931_v6  ;;  %1998 = vmatpush1.bf16.msra.mxu1 %v1997_v57 }
  0xee   : > { %1934 = vmatprep.subr.bf16.mxu0 %v1933_v7 }
  0xf1   : > { %1936 = vmatpush1.bf16.msra.mxu0 %v1935_v12 }
  0xf2   : > { %1938 = vmatprep.subr.bf16.mxu0 %v1937_v13 }
  0xf5   : > { %1940 = vmatpush1.bf16.msra.mxu0 %v1939_v18 }
  0xf6   : > { %1942 = vmatprep.subr.bf16.mxu0 %v1941_v19 }
  0xf9   : > { %1944 = vmatpush1.bf16.msra.mxu0 %v1943_v24 }
  0xfa   : > { %1946 = vmatprep.subr.bf16.mxu0 %v1945_v25 }
  0xfd   : > { %1948 = vmatpush1.bf16.msra.mxu0 %v1947_v30  ;;  %v1999_v30 = vpack.c.bf16 %v308_v29, %v306_v28  ;;  %v1660_v29 = vld [vmem:[%s3497_s2 + $0x190] sm:$0xff] }
  0xfe   : > { %1950 = vmatprep.subr.bf16.mxu0 %v1949_v32  ;;  %v305_v32 = vld [vmem:[%s3499_s4] sm:$0xff] }
  0xff   : > { %v2001_v34 = vpack.c.bf16 %v307_v33, %v305_v32  ;;  %2000 = vmatprep.subr.bf16.mxu1 %v1999_v30  ;;  %v1661_v30 = vld [vmem:[%s3497_s2 + $0x198] sm:$0xff]  ;;  %v1662_v33 = vld [vmem:[%s3497_s2 + $0x1a0] sm:$0xff] }
 0x100   : > { %v2041_v32 = vpack.c.bf16 %v1661_v30, %v1660_v29  ;;  %v1132_v30 = vld [vmem:[%s3497_s2 + $0x80] sm:$0xff] }
 0x101   : > { %1952 = vmatpush1.bf16.msra.mxu0 %v1951_v37  ;;  %v2003_v37 = vpack.c.bf16 %v312_v36, %v310_v35  ;;  %v1664_v36 = vld [vmem:[%s3497_s2 + $0x1b0] sm:$0xff] }
 0x102   : > { %1954 = vmatprep.subr.bf16.mxu0 %v1953_v38  ;;  %v309_v38 = vld [vmem:[%s3499_s4 + $0x20] sm:$0xff] }
 0x103   : > { %v2005_v40 = vpack.c.bf16 %v311_v39, %v309_v38  ;;  %v1079_v39 = vlaneseq }
 0x105   : > { %1956 = vmatpush1.bf16.msra.mxu0 %v1955_v41  ;;  %v2160_v41 = vmov 0.0  }
 0x108   : > { %871 = vmatmul.mubr.f32.vlgmr.msra.gmra.mrb[0].mxu0 %v318_v42 }
 0x1db   : > { %v3095_v58 = vpop.f32.mrb[0].mxu0 }
 0x1dc   : > { %v878_v59 = vsel %vm877_vm0, %v3095_v58, 0.0  ;;  %v893_v60 = vmul.f32 %v3095_v58, %v3095_v58  ;;  %v3100_v61 = vpop.f32.mrb[1].mxu0 }
 0x1dd   : > { %v879_v62 = vrot.slane %v878_v59, 4  ;;  %v886_v63 = vsel %vm885_vm1, %v3100_v61, 0.0  ;;  %v894_v0 = vmul.f32 %v3100_v61, %v3100_v61 }
 0x1de   : > { %v895_v1 = vsel %vm877_vm0, %v893_v60, 0.0  ;;  %v887_v2 = vrot.slane %v886_v63, 4  ;;  %v2008_v60 = vpack.c.bf16 %v1639_v56, %v1638_v55 }
 0x1df   : > { %v880_v3 = vadd.f32 %v879_v62, %v878_v59  ;;  %v896_v4 = vrot.slane %v895_v1, 4  ;;  %v902_v5 = vsel %vm885_vm1, %v894_v0, 0.0  ;;  %v1640_v62 = vld [vmem:[%s3497_s2 + $0xf0] sm:$0xff] }
 0x1e0   : > { %v888_v6 = vadd.f32 %v887_v2, %v886_v63  ;;  %v903_v7 = vrot.slane %v902_v5, 4  ;;  %v1641_v63 = vld [vmem:[%s3497_s2 + $0xf8] sm:$0xff]  ;;  %v1642_v2 = vld [vmem:[%s3497_s2 + $0x100] sm:$0xff] }
 0x1e1   : > { %v881_v8 = vrot.slane %v880_v3, 2  ;;  %v897_v9 = vadd.f32 %v896_v4, %v895_v1  ;;  %v2011_v1 = vpack.c.bf16 %v1641_v63, %v1640_v62 }
 0x1e2   : > { %v889_v10 = vrot.slane %v888_v6, 2  ;;  %v904_v11 = vadd.f32 %v903_v7, %v902_v5  ;;  %v1644_v5 = vld [vmem:[%s3497_s2 + $0x110] sm:$0xff] }
 0x1e3   : > { %v882_v12 = vadd.f32 %v881_v8, %v880_v3  ;;  %v898_v13 = vrot.slane %v897_v9, 2  ;;  %v1643_v3 = vld [vmem:[%s3497_s2 + $0x108] sm:$0xff]  ;;  %v1646_v8 = vld [vmem:[%s3497_s2 + $0x120] sm:$0xff] }
 0x1e4   : > { %v890_v14 = vadd.f32 %v889_v10, %v888_v6  ;;  %v905_v15 = vrot.slane %v904_v11, 2  ;;  %v2014_v4 = vpack.c.bf16 %v1643_v3, %v1642_v2  ;;  %v1645_v6 = vld [vmem:[%s3497_s2 + $0x118] sm:$0xff] }
 0x1e5   : > { %v899_v16 = vadd.f32 %v898_v13, %v897_v9  ;;  %v883_v19 = vrot.slane %v882_v12, 1  ;;  %v2017_v7 = vpack.c.bf16 %v1645_v6, %v1644_v5  ;;  %v1647_v9 = vld [vmem:[%s3497_s2 + $0x128] sm:$0xff]  ;;  %v1118_v6 = vld [vmem:[%s3497_s2 + $0x10] sm:$0xff] }
 0x1e6   : > { %v891_v17 = vrot.slane %v890_v14, 1  ;;  %v906_v18 = vadd.f32 %v905_v15, %v904_v11  ;;  %v2020_v10 = vpack.c.bf16 %v1647_v9, %v1646_v8  ;;  %v1648_v11 = vld [vmem:[%s3497_s2 + $0x130] sm:$0xff]  ;;  %v1651_v15 = vld [vmem:[%s3497_s2 + $0x148] sm:$0xff] }
 0x1e7   : > { %v900_v20 = vrot.slane %v899_v16, 1  ;;  %v884_v25 = vadd.f32 %v883_v19, %v882_v12  ;;  %v1649_v12 = vld [vmem:[%s3497_s2 + $0x138] sm:$0xff] }
 0x1e8   : > { %v907_v21 = vrot.slane %v906_v18, 1  ;;  %v892_v23 = vadd.f32 %v891_v17, %v890_v14  ;;  %v2023_v13 = vpack.c.bf16 %v1649_v12, %v1648_v11  ;;  %v1650_v14 = vld [vmem:[%s3497_s2 + $0x140] sm:$0xff]  ;;  %v1652_v17 = vld [vmem:[%s3497_s2 + $0x150] sm:$0xff] }
 0x1e9   : > { %v901_v22 = vadd.f32 %v900_v20, %v899_v16  ;;  %v2026_v16 = vpack.c.bf16 %v1651_v15, %v1650_v14  ;;  %v1654_v20 = vld [vmem:[%s3497_s2 + $0x160] sm:$0xff]  ;;  %v1122_v15 = vld [vmem:[%s3497_s2 + $0x30] sm:$0xff] }
 0x1ea   : > { %v908_v24 = vadd.f32 %v907_v21, %v906_v18  ;;  %v1653_v18 = vld [vmem:[%s3497_s2 + $0x158] sm:$0xff]  ;;  %v1655_v21 = vld [vmem:[%s3497_s2 + $0x168] sm:$0xff]  ;;  %v1120_v12 = vld [vmem:[%s3497_s2 + $0x20] sm:$0xff] }
 0x1eb   : > { %v910_v27 = vsel %vm909_vm2, %v884_v25, %v901_v22  ;;  %v2029_v19 = vpack.c.bf16 %v1653_v18, %v1652_v17  ;;  %v2032_v22 = vpack.c.bf16 %v1655_v21, %v1654_v20  ;;  %v1124_v18 = vld [vmem:[%s3497_s2 + $0x40] sm:$0xff]  ;;  %v1126_v21 = vld [vmem:[%s3497_s2 + $0x50] sm:$0xff] }
 0x1ec   : > { %v911_v26 = vsel %vm909_vm2, %v892_v23, %v908_v24  ;;  %v1656_v23 = vld [vmem:[%s3497_s2 + $0x170] sm:$0xff]  ;;  %v1657_v24 = vld [vmem:[%s3497_s2 + $0x178] sm:$0xff] }
 0x1ed   : > { %1636 = vmatprep.mubr.msk.f32.mxu1 %vm912_vm3, %v911_v26  ;;  %v2035_v25 = vpack.c.bf16 %v1657_v24, %v1656_v23  ;;  %v1658_v26 = vld [vmem:[%s3497_s2 + $0x180] sm:$0xff] }
 0x1ee   : > { %981 = vmatmul.mubr.f32.vlgmr.msra.gmra.mrb[0].mxu1 %v910_v27  ;;  %v1659_v27 = vld [vmem:[%s3497_s2 + $0x188] sm:$0xff]  ;;  %v1128_v24 = vld [vmem:[%s3497_s2 + $0x60] sm:$0xff] }
 0x1ef   : > { %2002 = vmatpush1.bf16.msra.mxu1 %v2001_v34  ;;  %1072 = vmatprep.mubr.f32.mxu1 %v2160_v41  ;;  %v2038_v28 = vpack.c.bf16 %v1659_v27, %v1658_v26  ;;  %v1663_v34 = vld [vmem:[%s3497_s2 + $0x1a8] sm:$0xff]  ;;  %v1130_v27 = vld [vmem:[%s3497_s2 + $0x70] sm:$0xff] }
 0x1f0   : > { %2004 = vmatprep.subr.bf16.mxu1 %v2003_v37  ;;  %v2044_v35 = vpack.c.bf16 %v1663_v34, %v1662_v33  ;;  %v1665_v37 = vld [vmem:[%s3497_s2 + $0x1b8] sm:$0xff]  ;;  %v1134_v34 = vld [vmem:[%s3497_s2 + $0x90] sm:$0xff] }
 0x1f1   : > { %v2047_v38 = vpack.c.bf16 %v1665_v37, %v1664_v36  ;;  %v1136_v37 = vld [vmem:[%s3497_s2 + $0xa0] sm:$0xff] }
 0x1f3   : > { %2006 = vmatpush1.bf16.msra.mxu1 %v2005_v40  ;;  %v1080_v40 = vshrl.u32 %v1079_v39, 7 }
 0x1f4   : > { %2007 = vmatprep.subr.bf16.mxu1 %v2159_v31 }
 0x1f5   : > { %v1081_v41 = vsub.s32 0, %v1080_v40 }
 0x2c1   : > { %v982_v42 = vpop.f32.mrb[0].mxu1 }
 0x2c2   : > { %v986_v43 = vmul.f32 0.020408163, %v982_v42  ;;  %v984_v44 = vpop.f32.mrb[1].mxu1  ;;  %v1091_v42 = vsub.s32 1, %v1080_v40  ;;  %v1138_v40 = vld [vmem:[%s3497_s2 + $0xb0] sm:$0xff] }
 0x2c4   : > { %v987_v45 = vmul.f32 %v986_v43, %v986_v43 }
 0x2c6   : > { %v989_v46 = vrot.slane %v987_v45, 7 }
 0x2c8   : > { %v991_v47 = vsub.f32 %v986_v43, %v989_v46 }
 0x2ca   : > { %v992_v48 = vadd.f32 1e-05, %v991_v47 }
 0x2cc   : > { %2149 = vrsqrt.f32 %v992_v48 }
 0x2d6   : > { %v2150_v49 = vpop.eup %2149 }
 0x2d7   : > { %v995_v51 = vrot.slane %v2150_v49, 1 }
 0x2d9   : > { %v997_v52 = vmul.f32 %v995_v51, %v313_v50 }
 0x2db   : > { %v998_v54 = vmul.f32 %v997_v52, %v986_v43 }
 0x2dd   : > { %v999_v57 = vsub.f32 %v314_v53, %v998_v54 }
 0x2df   : > { %v1001_v59 = vrot.slane %v999_v57, 7 }
 0x2e1   : > { %v1003_v0 = vsel %vm909_vm2, %v997_v52, %v1001_v59 }
 0x2e2   : > { %1637 = vmatmul.mubr.msk.f32.vlgmr.msra.gmra.mrb[2].mxu1 %vm1004_vm4, %v1003_v0 }
 0x2e3   : > { %2009 = vmatpush1.bf16.msra.mxu1 %v2008_v60 }
 0x2e4   : > { %2010 = vmatprep.subr.bf16.mxu1 %v2159_v31 }
 0x2e7   : > { %2012 = vmatpush1.bf16.msra.mxu1 %v2011_v1 }
 0x2e8   : > { %2013 = vmatprep.subr.bf16.mxu1 %v2159_v31 }
 0x2eb   : > { %2015 = vmatpush1.bf16.msra.mxu1 %v2014_v4 }
 0x2ec   : > { %2016 = vmatprep.subr.bf16.mxu1 %v2159_v31 }
 0x2ef   : > { %2018 = vmatpush1.bf16.msra.mxu1 %v2017_v7  ;;  %v1119_v7 = vld [vmem:[%s3497_s2 + $0x18] sm:$0xff] }
 0x2f0   : > { %2019 = vmatprep.subr.bf16.mxu1 %v2159_v31  ;;  %v2053_v11 = vpack.c.bf16 %v1119_v7, %v1118_v6  ;;  %v1679_v6 = vld [vmem:[%s3497_s2 + $0x218] sm:$0xff] }
 0x2f3   : > { %2021 = vmatpush1.bf16.msra.mxu1 %v2020_v10 }
 0x2f4   : > { %2022 = vmatprep.subr.bf16.mxu1 %v2159_v31 }
 0x2f7   : > { %2024 = vmatpush1.bf16.msra.mxu1 %v2023_v13  ;;  %v1121_v13 = vld [vmem:[%s3497_s2 + $0x28] sm:$0xff] }
 0x2f8   : > { %2025 = vmatprep.subr.bf16.mxu1 %v2159_v31  ;;  %v2056_v14 = vpack.c.bf16 %v1121_v13, %v1120_v12  ;;  %v1682_v12 = vld [vmem:[%s3497_s2 + $0x230] sm:$0xff]  ;;  %v1683_v13 = vld [vmem:[%s3497_s2 + $0x238] sm:$0xff] }
 0x2fb   : > { %2027 = vmatpush1.bf16.msra.mxu1 %v2026_v16  ;;  %v1123_v16 = vld [vmem:[%s3497_s2 + $0x38] sm:$0xff] }
 0x2fc   : > { %2028 = vmatprep.subr.bf16.mxu1 %v2159_v31  ;;  %v2059_v17 = vpack.c.bf16 %v1123_v16, %v1122_v15  ;;  %v1684_v15 = vld [vmem:[%s3497_s2 + $0x240] sm:$0xff]  ;;  %v1685_v16 = vld [vmem:[%s3497_s2 + $0x248] sm:$0xff] }
 0x2ff   : > { %2030 = vmatpush1.bf16.msra.mxu1 %v2029_v19  ;;  %v1125_v19 = vld [vmem:[%s3497_s2 + $0x48] sm:$0xff] }
 0x300   : > { %2031 = vmatprep.subr.bf16.mxu1 %v2159_v31  ;;  %v2062_v20 = vpack.c.bf16 %v1125_v19, %v1124_v18  ;;  %v1686_v18 = vld [vmem:[%s3497_s2 + $0x250] sm:$0xff]  ;;  %v1687_v19 = vld [vmem:[%s3497_s2 + $0x258] sm:$0xff] }
 0x303   : > { %2033 = vmatpush1.bf16.msra.mxu1 %v2032_v22  ;;  %v1127_v22 = vld [vmem:[%s3497_s2 + $0x58] sm:$0xff] }
 0x304   : > { %2034 = vmatprep.subr.bf16.mxu1 %v2159_v31  ;;  %v2065_v23 = vpack.c.bf16 %v1127_v22, %v1126_v21  ;;  %v1688_v21 = vld [vmem:[%s3497_s2 + $0x260] sm:$0xff]  ;;  %v1689_v22 = vld [vmem:[%s3497_s2 + $0x268] sm:$0xff] }
 0x307   : > { %2036 = vmatpush1.bf16.msra.mxu1 %v2035_v25  ;;  %v1129_v25 = vld [vmem:[%s3497_s2 + $0x68] sm:$0xff] }
 0x308   : > { %2037 = vmatprep.subr.bf16.mxu1 %v2159_v31  ;;  %v2068_v26 = vpack.c.bf16 %v1129_v25, %v1128_v24  ;;  %v1690_v24 = vld [vmem:[%s3497_s2 + $0x270] sm:$0xff]  ;;  %v1691_v25 = vld [vmem:[%s3497_s2 + $0x278] sm:$0xff] }
 0x30b   : > { %2039 = vmatpush1.bf16.msra.mxu1 %v2038_v28  ;;  %v1131_v28 = vld [vmem:[%s3497_s2 + $0x78] sm:$0xff] }
 0x30c   : > { %2040 = vmatprep.subr.bf16.mxu1 %v2159_v31  ;;  %v2071_v29 = vpack.c.bf16 %v1131_v28, %v1130_v27  ;;  %v1692_v27 = vld [vmem:[%s3497_s2 + $0x280] sm:$0xff]  ;;  %v1693_v28 = vld [vmem:[%s3497_s2 + $0x288] sm:$0xff] }
 0x30f   : > { %2042 = vmatpush1.bf16.msra.mxu1 %v2041_v32  ;;  %v1133_v32 = vld [vmem:[%s3497_s2 + $0x88] sm:$0xff] }
 0x310   : > { %2043 = vmatprep.subr.bf16.mxu1 %v2159_v31  ;;  %v2074_v33 = vpack.c.bf16 %v1133_v32, %v1132_v30  ;;  %v1694_v30 = vld [vmem:[%s3497_s2 + $0x290] sm:$0xff]  ;;  %v1695_v32 = vld [vmem:[%s3497_s2 + $0x298] sm:$0xff] }
 0x313   : > { %2045 = vmatpush1.bf16.msra.mxu1 %v2044_v35  ;;  %v1135_v35 = vld [vmem:[%s3497_s2 + $0x98] sm:$0xff] }
 0x314   : > { %2046 = vmatprep.subr.bf16.mxu1 %v2159_v31  ;;  %v2077_v36 = vpack.c.bf16 %v1135_v35, %v1134_v34 }
 0x317   : > { %2048 = vmatpush1.bf16.msra.mxu1 %v2047_v38  ;;  %v1137_v38 = vld [vmem:[%s3497_s2 + $0xa8] sm:$0xff] }
 0x318   : > { %2049 = vmatprep.subr.bf16.mxu1 %v2159_v31  ;;  %v2080_v39 = vpack.c.bf16 %v1137_v38, %v1136_v37 }
 0x3b5   : > { %v1074_v43 = vpop.f32.mrb[2].mxu1 }
 0x3b6   : > { %v1082_v44 = vrot.slane %v1074_v43, %v1081_v41  ;;  %v1076_v45 = vpop.f32.mrb[3].mxu1  ;;  %v1092_v48 = vrot.slane %v1074_v43, %v1091_v42  ;;  %v1140_v43 = vld [vmem:[%s3497_s2 + $0xc0] sm:$0xff] }
 0x3b7   : > { %v1086_v46 = vrot.slane %v1076_v45, %v1081_v41  ;;  %v1096_v50 = vrot.slane %v1076_v45, %v1091_v42  ;;  %v1139_v41 = vld [vmem:[%s3497_s2 + $0xb8] sm:$0xff] }
 0x3b8   : > { %v1087_v47 = vmul.f32 %v1082_v44, %v3095_v58  ;;  %v1116_v58 = vld [vmem:[%s3497_s2] sm:$0xff]  ;;  %v2083_v42 = vpack.c.bf16 %v1139_v41, %v1138_v40  ;;  %v1141_v44 = vld [vmem:[%s3497_s2 + $0xc8] sm:$0xff] }
 0x3b9   : > { %v1088_v49 = vmul.f32 %v1086_v46, %v3100_v61  ;;  %v1117_v61 = vld [vmem:[%s3497_s2 + $0x8] sm:$0xff]  ;;  %v2086_v45 = vpack.c.bf16 %v1141_v44, %v1140_v43  ;;  %v1142_v46 = vld [vmem:[%s3497_s2 + $0xd0] sm:$0xff] }
 0x3ba   : > { %v1097_v51 = vadd.f32 %v1092_v48, %v1087_v47  ;;  %v2050_v3 = vpack.c.bf16 %v1117_v61, %v1116_v58  ;;  %v1143_v47 = vld [vmem:[%s3497_s2 + $0xd8] sm:$0xff]  ;;  %v1670_v61 = vld [vmem:[%s3497_s2 + $0x1d0] sm:$0xff] }
 0x3bb   : > { %v1098_v52 = vadd.f32 %v1096_v50, %v1088_v49  ;;  %v2089_v48 = vpack.c.bf16 %v1143_v47, %v1142_v46  ;;  %v1668_v49 = vld [vmem:[%s3497_s2 + $0x1c0] sm:$0xff]  ;;  %v1669_v50 = vld [vmem:[%s3497_s2 + $0x1c8] sm:$0xff] }
 0x3bc   : > { %v3240_v53 = vmax.f32 %v1097_v51, 0.0 }
 0x3bd   : > { %v3242_v54 = vmax.f32 %v1098_v52, 0.0 }
 0x3be   : > { %v1103_v55 = vrot.slane %v3240_v53, 1  ;;  %v3246_v56 = vrot.slane %v3240_v53, 2  ;;  %v1144_v57 = vrot.slane %v3240_v53, 3  ;;  %v1327_v59 = vrot.slane %v3240_v53, 4 }
 0x3bf   : > { %v1104_v60 = vrot.slane %v3242_v54, 1  ;;  %v3258_v62 = vrot.slane %v3242_v54, 2  ;;  %v1145_v63 = vrot.slane %v3242_v54, 3  ;;  %v1328_v52 = vrot.slane %v3242_v54, 4 }
 0x3c0   : > { %v1148_v0 = vsel %vm909_vm2, %v1103_v55, %v3246_v56  ;;  %v1331_v1 = vsel %vm909_vm2, %v3246_v56, %v1144_v57  ;;  %v1111_v51 = vsel %vm909_vm2, %v3240_v53, %v1103_v55 }
 0x3c1   : > { %v1149_v2 = vsel %vm909_vm2, %v1104_v60, %v3258_v62  ;;  %v1112_v4 = vsel %vm909_vm2, %v3242_v54, %v1104_v60  ;;  %v3281_v8 = vsel %vm1113_vm5, %v1331_v1, %v1327_v59  ;;  %v1150_v9 = vsel %vm1113_vm5, %v1148_v0, %v1144_v57  ;;  %v1671_v59 = vld [vmem:[%s3497_s2 + $0x1d8] sm:$0xff]  ;;  %v1672_v60 = vld [vmem:[%s3497_s2 + $0x1e0] sm:$0xff] }
 0x3c2   : > { %v1151_v5 = vsel %vm1113_vm5, %v1149_v2, %v1145_v63  ;;  %v1115_v10 = vsel %vm1113_vm5, %v1112_v4, %v3258_v62  ;;  %v2092_v57 = vpack.c.bf16 %v1669_v50, %v1668_v49  ;;  %v1332_v58 = vsel %vm909_vm2, %v3258_v62, %v1145_v63  ;;  %v1673_v62 = vld [vmem:[%s3497_s2 + $0x1e8] sm:$0xff]  ;;  %v1675_v0 = vld [vmem:[%s3497_s2 + $0x1f8] sm:$0xff]  ;;  %v1676_v2 = vld [vmem:[%s3497_s2 + $0x200] sm:$0xff] }
 0x3c3   : > { %1666 = vmatprep.mubr.msk.f32.mxu1 %vm912_vm3, %v1151_v5  ;;  %v1114_v53 = vsel %vm1113_vm5, %v1111_v51, %v3246_v56  ;;  %v1334_v55 = vsel %vm1113_vm5, %v1332_v58, %v1328_v52  ;;  %v2095_v54 = vpack.c.bf16 %v1671_v59, %v1670_v61  ;;  %v2098_v63 = vpack.c.bf16 %v1673_v62, %v1672_v60  ;;  %v1674_v56 = vld [vmem:[%s3497_s2 + $0x1f0] sm:$0xff] }
 0x3c4   : > { %1249 = vmatmul.mubr.f32.vlgmr.msra.gmra.mrb[4].mxu1 %v1150_v9  ;;  %v2101_v1 = vpack.c.bf16 %v1675_v0, %v1674_v56  ;;  %v1678_v5 = vld [vmem:[%s3497_s2 + $0x210] sm:$0xff]  ;;  %v1680_v9 = vld [vmem:[%s3497_s2 + $0x220] sm:$0xff] }
 0x3c5   : > { %2051 = vmatpush1.bf16.msra.mxu1 %v2050_v3  ;;  %1667 = vmatprep.mubr.msk.f32.mxu1 %vm912_vm3, %v1115_v10  ;;  %v1677_v3 = vld [vmem:[%s3497_s2 + $0x208] sm:$0xff]  ;;  %v2107_v7 = vpack.c.bf16 %v1679_v6, %v1678_v5 }
 0x3c6   : > { %2052 = vmatprep.subr.bf16.mxu1 %v2159_v31  ;;  %v2104_v4 = vpack.c.bf16 %v1677_v3, %v1676_v2  ;;  %v1681_v10 = vld [vmem:[%s3497_s2 + $0x228] sm:$0xff] }
 0x3c9   : > { %2054 = vmatpush1.bf16.msra.mxu1 %v2053_v11  ;;  %v2110_v11 = vpack.c.bf16 %v1681_v10, %v1680_v9 }
 0x3ca   : > { %2055 = vmatprep.subr.bf16.mxu1 %v2159_v31 }
 0x3cd   : > { %2057 = vmatpush1.bf16.msra.mxu1 %v2056_v14  ;;  %v2113_v14 = vpack.c.bf16 %v1683_v13, %v1682_v12 }
 0x3ce   : > { %2058 = vmatprep.subr.bf16.mxu1 %v2159_v31 }
 0x3d1   : > { %2060 = vmatpush1.bf16.msra.mxu1 %v2059_v17  ;;  %v2116_v17 = vpack.c.bf16 %v1685_v16, %v1684_v15 }
 0x3d2   : > { %2061 = vmatprep.subr.bf16.mxu1 %v2159_v31 }
 0x3d5   : > { %2063 = vmatpush1.bf16.msra.mxu1 %v2062_v20  ;;  %v2119_v20 = vpack.c.bf16 %v1687_v19, %v1686_v18 }
 0x3d6   : > { %2064 = vmatprep.subr.bf16.mxu1 %v2159_v31 }
 0x3d9   : > { %2066 = vmatpush1.bf16.msra.mxu1 %v2065_v23  ;;  %v2122_v23 = vpack.c.bf16 %v1689_v22, %v1688_v21 }
 0x3da   : > { %2067 = vmatprep.subr.bf16.mxu1 %v2159_v31 }
 0x3dd   : > { %2069 = vmatpush1.bf16.msra.mxu1 %v2068_v26  ;;  %v2125_v26 = vpack.c.bf16 %v1691_v25, %v1690_v24 }
 0x3de   : > { %2070 = vmatprep.subr.bf16.mxu1 %v2159_v31 }
 0x3e1   : > { %2072 = vmatpush1.bf16.msra.mxu1 %v2071_v29  ;;  %v2128_v29 = vpack.c.bf16 %v1693_v28, %v1692_v27 }
 0x3e2   : > { %2073 = vmatprep.subr.bf16.mxu1 %v2159_v31 }
 0x3e5   : > { %2075 = vmatpush1.bf16.msra.mxu1 %v2074_v33  ;;  %v2131_v33 = vpack.c.bf16 %v1695_v32, %v1694_v30 }
 0x3e6   : > { %2076 = vmatprep.subr.bf16.mxu1 %v2159_v31 }
 0x3e9   : > { %2078 = vmatpush1.bf16.msra.mxu1 %v2077_v36 }
 0x3ea   : > { %2079 = vmatprep.subr.bf16.mxu1 %v2159_v31 }
 0x3ed   : > { %2081 = vmatpush1.bf16.msra.mxu1 %v2080_v39  ;;  %v1697_v39 = vld [vmem:[%s3501_s6] ss:$0 sm:$0xff] }
 0x3ee   : > { %2082 = vmatprep.subr.bf16.mxu1 %v2159_v31 }
 0x3f1   : > { %2084 = vmatpush1.bf16.msra.mxu1 %v2083_v42 }
 0x3f2   : > { %2085 = vmatprep.subr.bf16.mxu1 %v2159_v31 }
 0x3f5   : > { %2087 = vmatpush1.bf16.msra.mxu1 %v2086_v45 }
 0x3f6   : > { %2088 = vmatprep.subr.bf16.mxu1 %v2159_v31 }
 0x3f9   : > { %2090 = vmatpush1.bf16.msra.mxu1 %v2089_v48 }
 0x3fa   : > { %2091 = vmatprep.subr.bf16.mxu1 %v2159_v31 }
 0x3fc   : > { %1322 = vmatmul.mubr.f32.vlgmr.msra.gmra.mrb[6].mxu1 %v1114_v53 }
 0x3fd   : > { %2093 = vmatpush1.bf16.msra.mxu1 %v2092_v57  ;;  %1696 = vmatprep.mubr.msk.f32.mxu1 %vm912_vm3, %v1334_v55 }
 0x3fe   : > { %2094 = vmatprep.subr.bf16.mxu1 %v2159_v31 }
 0x401   : > { %2096 = vmatpush1.bf16.msra.mxu1 %v2095_v54 }
 0x402   : > { %2097 = vmatprep.subr.bf16.mxu1 %v2159_v31 }
 0x405   : > { %2099 = vmatpush1.bf16.msra.mxu1 %v2098_v63 }
 0x406   : > { %2100 = vmatprep.subr.bf16.mxu1 %v2159_v31 }
 0x409   : > { %2102 = vmatpush1.bf16.msra.mxu1 %v2101_v1 }
 0x40a   : > { %2103 = vmatprep.subr.bf16.mxu1 %v2159_v31 }
 0x40d   : > { %2105 = vmatpush1.bf16.msra.mxu1 %v2104_v4 }
 0x40e   : > { %2106 = vmatprep.subr.bf16.mxu1 %v2159_v31 }
 0x411   : > { %2108 = vmatpush1.bf16.msra.mxu1 %v2107_v7 }
 0x412   : > { %2109 = vmatprep.subr.bf16.mxu1 %v2159_v31 }
 0x415   : > { %2111 = vmatpush1.bf16.msra.mxu1 %v2110_v11 }
 0x416   : > { %2112 = vmatprep.subr.bf16.mxu1 %v2159_v31 }
 0x419   : > { %2114 = vmatpush1.bf16.msra.mxu1 %v2113_v14 }
 0x41a   : > { %2115 = vmatprep.subr.bf16.mxu1 %v2159_v31 }
 0x41d   : > { %2117 = vmatpush1.bf16.msra.mxu1 %v2116_v17 }
 0x41e   : > { %2118 = vmatprep.subr.bf16.mxu1 %v2159_v31 }
 0x421   : > { %2120 = vmatpush1.bf16.msra.mxu1 %v2119_v20 }
 0x422   : > { %2121 = vmatprep.subr.bf16.mxu1 %v2159_v31 }
 0x425   : > { %2123 = vmatpush1.bf16.msra.mxu1 %v2122_v23 }
 0x426   : > { %2124 = vmatprep.subr.bf16.mxu1 %v2159_v31 }
 0x429   : > { %2126 = vmatpush1.bf16.msra.mxu1 %v2125_v26 }
 0x42a   : > { %2127 = vmatprep.subr.bf16.mxu1 %v2159_v31 }
 0x42d   : > { %2129 = vmatpush1.bf16.msra.mxu1 %v2128_v29 }
 0x42e   : > { %2130 = vmatprep.subr.bf16.mxu1 %v2159_v31 }
 0x431   : > { %2132 = vmatpush1.bf16.msra.mxu1 %v2131_v33 }
 0x434   : > { %1432 = vmatmul.mubr.f32.vlgmr.msra.gmra.mrb[8].mxu1 %v3281_v8 }
 0x497   : > { %v1250_v34 = vpop.f32.mrb[4].mxu1 }
 0x498   : > { %v1252_v35 = vpop.f32.mrb[5].mxu1 }
 0x4cf   : > { %v1323_v36 = vpop.f32.mrb[6].mxu1 }
 0x4d0   : > { %v1324_v37 = vadd.f32 %v1323_v36, %v1250_v34  ;;  %v1325_v38 = vpop.f32.mrb[7].mxu1 }
 0x507   : > { %v1433_v40 = vpop.f32.mrb[8].mxu1 }
 0x508   : > { %v1437_v41 = vadd.f32 %v1433_v40, %v1324_v37  ;;  %v1435_v42 = vpop.f32.mrb[9].mxu1 }
 0x50a   : > { %v1444_v31 = vadd.f32 %v1697_v39, %v1437_v41 }
 0x50c   : > { %1446 = vst.msk [vmem:[%s276_s15] sm:$0x7] %vm1445_vm6, %v1444_v31 }
 0x50d PF: > { %s17_s24 = sadd.s32 1, %s2157_s24  }
 0x50e   : > { %p14_p4 = scmp.ge.s32.totalorder %s17_s24, 4  }
 0x510   :  { %16 = sbr.rel (!%p14_p4) target bundleno = 1 (0x1), region = 81 }

</bundles_post_ra>
